<compile_context>
chip_gen: v7x
topology: tpu7x:2x2x1
jax: 0.10.0
libtpu: 0.0.40
codegen_flags: <defaults>
</compile_context>

<pallas_src>
import functools

import jax
import jax.numpy as jnp
import numpy as np
from jax.experimental import pallas as pl
from jax.experimental.pallas import tpu as pltpu


def relative_pos_index_dis(height, width):
    """JAX port of the torch helper (semantics identical, indexing='ij')."""
    coords_h = jnp.arange(height)
    coords_w = jnp.arange(width)
    coords = jnp.stack(jnp.meshgrid(coords_h, coords_w, indexing="ij"))   # (2,H,W)
    coords_flat = coords.reshape(2, -1)                                   # (2,HW)
    rel = coords_flat[:, :, None] - coords_flat[:, None, :]               # (2,HW,HW)
    rel = rel.transpose(1, 2, 0)                                          # (HW,HW,2)
    dis = (rel[:, :, 0].astype(jnp.float32) / height) ** 2 + \
          (rel[:, :, 1].astype(jnp.float32) / width) ** 2
    rel = rel.at[:, :, 0].add(height - 1)
    rel = rel.at[:, :, 1].add(width - 1)
    rel = rel.at[:, :, 0].multiply(2 * width - 1)
    relative_position_index = rel.sum(-1)
    return relative_position_index, dis


def _softmax_rows(logits):
    """Row softmax; the divide is replaced by an EUP approximate reciprocal on the
    tiny (N,1) row-sum plus one Newton step (keeps ~f32 accuracy, no wide VALU div)."""
    m = jnp.max(logits, axis=-1, keepdims=True)
    e = jnp.exp(logits - m)
    s = jnp.sum(e, axis=-1, keepdims=True)
    r = pl.reciprocal(s, approx=True)
    r = r * (2.0 - s * r)                       # one Newton refinement step
    return e * r


def _attn_dvit_kernel(x_ref, wqkv_ref, wout_ref, bout_ref, bias_ref,
                      y_ref, attn0_ref, *, heads, dim_head, scale,
                      n, dm, y_pack, y_rows, a_chunks, a_rows):
    """One batch element per grid step.  All matmuls / softmaxes live here."""
    inner = heads * dim_head

    x = x_ref[0].astype(jnp.float32)                      # (N, Dm)
    wqkv = wqkv_ref[...].astype(jnp.float32)              # (Dm, 3*inner)
    wout = wout_ref[...].astype(jnp.float32)              # (inner, Dm)

    # Single fused projection: one MXU push instead of 3*heads tiny (Dm, d) ones.
    qkv = jnp.dot(x, wqkv, preferred_element_type=jnp.float32)   # (N, 3*inner)

    y_acc = jnp.zeros((n, dm), jnp.float32)
    attn0_pieces = []
    for h in range(heads):                                # heads is tiny -> static unroll
        lo = h * dim_head                                 # lane slices at multiples of 8
        q = qkv[:, lo:lo + dim_head]                      # (N, d)
        k = qkv[:, inner + lo:inner + lo + dim_head]      # (N, d)
        v = qkv[:, 2 * inner + lo:2 * inner + lo + dim_head]

        dots0 = jnp.dot(q, k.T, preferred_element_type=jnp.float32) * scale   # (N, N)

        # attn0 = softmax(q k^T * scale), no positional bias -> second module output.
        attn0 = _softmax_rows(dots0)
        for c in range(a_chunks):                         # sublane-aligned row chunks
            attn0_pieces.append(attn0[c * a_rows:(c + 1) * a_rows, :])

        # attn = softmax(dots0 + relative_position_bias + 0.01 * pos_embed)
        attn = _softmax_rows(dots0 + bias_ref[h].astype(jnp.float32))

        o_h = jnp.dot(attn, v, preferred_element_type=jnp.float32)            # (N, d)
        # Distribute the output projection over heads (no concat of head outputs):
        # w_out row slices are sublane-aligned (multiples of 8).
        y_acc = y_acc + jnp.dot(o_h, wout[lo:lo + dim_head, :],
                                preferred_element_type=jnp.float32)

    y = y_acc + bout_ref[...].astype(jnp.float32)         # (N, Dm) + (1, Dm)

    # Lane-dense stores: pack each output into a (rows, 128) tile so the store /
    # writeback is full-width; the wrapper undoes the packing cheaply outside.
    y_dense = jnp.concatenate(
        [y[c * y_rows:(c + 1) * y_rows, :] for c in range(y_pack)], axis=1)  # (y_rows,128)
    y_ref[0] = y_dense.astype(y_ref.dtype)
    attn0_ref[0] = jnp.concatenate(attn0_pieces, axis=1)                     # (a_rows,128)


def attention_dvit_pallas(x, w_qkv, w_out, b_out, bias, *, heads, dim_head):
    """x: [B,N,Dm]; w_qkv: [Dm, 3*inner]; w_out: [inner, Dm]; b_out: [Dm];
       bias: [H,N,N] additive logit bias (pass zeros for the plain dots=dots0 path)."""
    B, N, Dm = x.shape
    inner = heads * dim_head
    scale = dim_head ** (-0.5)

    # Lane-dense packing geometry (holds for the module's small shapes).
    assert 128 % Dm == 0 and N % (128 // Dm) == 0, "y packing needs Dm|128 and (128/Dm)|N"
    y_pack = 128 // Dm                      # row-chunks of y packed side by side
    y_rows = N // y_pack                    # sublane rows of the packed y tile
    assert (heads * N * N) % 128 == 0
    a_rows = (heads * N * N) // 128         # sublane rows of the packed attn0 tile
    assert N % a_rows == 0
    a_chunks = N // a_rows                  # row-chunks per head

    kernel = functools.partial(
        _attn_dvit_kernel, heads=heads, dim_head=dim_head, scale=scale,
        n=N, dm=Dm, y_pack=y_pack, y_rows=y_rows, a_chunks=a_chunks, a_rows=a_rows)

    out_shapes = (
        jax.ShapeDtypeStruct((B, y_rows, 128), x.dtype),        # packed y
        jax.ShapeDtypeStruct((B, a_rows, 128), jnp.float32),    # packed softmax(dots0)
    )
    grid_spec = pltpu.PrefetchScalarGridSpec(
        num_scalar_prefetch=0,
        grid=(B,),                                              # one batch element / step
        in_specs=[
            pl.BlockSpec((1, N, Dm), lambda b: (b, 0, 0)),
            pl.BlockSpec((Dm, 3 * inner), lambda b: (0, 0)),    # original fused qkv weight
            pl.BlockSpec((inner, Dm), lambda b: (0, 0)),
            pl.BlockSpec((1, Dm), lambda b: (0, 0)),
            pl.BlockSpec((heads, N, N), lambda b: (0, 0, 0)),
        ],
        out_specs=[
            pl.BlockSpec((1, y_rows, 128), lambda b: (b, 0, 0)),
            pl.BlockSpec((1, a_rows, 128), lambda b: (b, 0, 0)),
        ],
    )
    y_raw, attn0_raw = pl.pallas_call(
        kernel,
        out_shape=out_shapes,
        grid_spec=grid_spec,
        # "parallel": v7x's two TensorCores take one batch element each; on single-TC
        # v5e/v6e the extra grid step costs ~0.35us (folding B would save only that).
        compiler_params=pltpu.CompilerParams(dimension_semantics=("parallel",)),
    )(x, w_qkv, w_out, b_out.reshape(1, Dm), bias)

    # Undo the lane-dense packing (cheap XLA reshapes/transposes on tiny arrays).
    y = y_raw.reshape(B, y_rows, y_pack, Dm).transpose(0, 2, 1, 3).reshape(B, N, Dm)
    attn0 = (attn0_raw.reshape(B, a_rows, heads, a_chunks, N)
             .transpose(0, 2, 3, 1, 4).reshape(B, heads, N, N))
    return y, attn0


def attention_dvit_reference(x, w_qkv, w_out, b_out, bias, *, heads, dim_head):
    """Pure-JAX reference mirroring the torch forward (biased path via `bias`)."""
    B, N, Dm = x.shape
    inner = heads * dim_head
    scale = dim_head ** (-0.5)
    qkv = x @ w_qkv
    q, k, v = jnp.split(qkv, 3, axis=-1)
    to_heads = lambda t: t.reshape(B, N, heads, dim_head).transpose(0, 2, 1, 3)
    q, k, v = map(to_heads, (q, k, v))
    dots0 = jnp.einsum("bhnd,bhmd->bhnm", q, k) * scale
    attn = jax.nn.softmax(dots0 + bias[None], axis=-1)
    attn0 = jax.nn.softmax(dots0, axis=-1)
    out = jnp.einsum("bhnm,bhmd->bhnd", attn, v)
    out = out.transpose(0, 2, 1, 3).reshape(B, N, inner)
    return out @ w_out + b_out, attn0


if __name__ == "__main__":
    # Small shapes consistent with the module:
    #   dim=32, heads=4, dim_head=8 -> inner_dim=32, num_patches=16 -> 4x4 grid.
    B, dim, heads, dim_head, num_patches = 2, 32, 4, 8, 16
    height = width = int(np.sqrt(num_patches))
    N = num_patches
    inner = heads * dim_head

    key = jax.random.PRNGKey(0)
    kx, kq, ko, kb = jax.random.split(key, 4)
    x = jax.random.normal(kx, (B, N, dim), jnp.float32)

    # Deterministic parameter init (shapes from __init__), weights stored [in, out].
    w_qkv = jax.random.normal(kq, (dim, inner * 3), jnp.float32) * 0.1   # to_qkv (no bias)
    w_out = jax.random.normal(ko, (inner, dim), jnp.float32) * 0.1       # to_out Linear weight
    b_out = jax.random.normal(kb, (dim,), jnp.float32) * 0.1             # to_out Linear bias
    headsita = jnp.zeros((heads,), jnp.float32) + jnp.arange(1, heads + 1, dtype=jnp.float32) * 0.1
    rel_pos_bias_table = jnp.zeros(((2 * height - 1) * (2 * width - 1), heads), jnp.float32)

    # rpe parameter prep (independent of x): additive [H, N, N] logit bias.
    rpi, dis = relative_pos_index_dis(height, width)
    rel_bias = rel_pos_bias_table[rpi.reshape(-1)].reshape(N, N, heads).transpose(2, 0, 1)
    factor = 1.0 / (2.0 * headsita ** 2 + 1e-10)
    pos_embed = jnp.exp(-factor[:, None, None] * dis[None, :, :])
    bias = rel_bias + 0.01 * pos_embed                                   # (H, N, N)

    y, attn0 = attention_dvit_pallas(x, w_qkv, w_out, b_out, bias,
                                     heads=heads, dim_head=dim_head)
    jax.block_until_ready((y, attn0))

    y_exp, attn0_exp = attention_dvit_reference(x, w_qkv, w_out, b_out, bias,
                                                heads=heads, dim_head=dim_head)
    assert np.allclose(np.asarray(y), np.asarray(y_exp), atol=1e-4, rtol=1e-4), "y mismatch"
    # 5e-5 (vs 1e-5 before): approx reciprocal + one Newton step in the softmax denom.
    assert np.allclose(np.asarray(attn0), np.asarray(attn0_exp), atol=5e-5, rtol=5e-5), "attn0 mismatch"
    print("KERNEL_OK")
</pallas_src>

<mosaic_0001>
module attributes {stable_mosaic.version = 11 : i64} {
  func.func @_attn_dvit_kernel(%arg0: i32, %arg1: memref<1x16x32xf32, #tpu.memory_space<vmem>>, %arg2: memref<32x96xf32, #tpu.memory_space<vmem>>, %arg3: memref<32x32xf32, #tpu.memory_space<vmem>>, %arg4: memref<1x32xf32, #tpu.memory_space<vmem>>, %arg5: memref<4x16x16xf32, #tpu.memory_space<vmem>>, %arg6: memref<1x4x128xf32, #tpu.memory_space<vmem>>, %arg7: memref<1x8x128xf32, #tpu.memory_space<vmem>>) attributes {dimension_semantics = [#tpu.dimension_semantics<parallel>], iteration_bounds = array<i64: 2>, scalar_prefetch = 0 : i64, scratch_operands = 0 : i64, tpu.core_type = #tpu.core_type<tc>, window_params = [{transform_indices = @transform_0, window_bounds = array<i64: 1, 16, 32>}, {pipeline_mode = #tpu.pipeline_mode<synchronous>, transform_indices = @transform_1, window_bounds = array<i64: 32, 96>}, {pipeline_mode = #tpu.pipeline_mode<synchronous>, transform_indices = @transform_2, window_bounds = array<i64: 32, 32>}, {pipeline_mode = #tpu.pipeline_mode<synchronous>, transform_indices = @transform_3, window_bounds = array<i64: 1, 32>}, {pipeline_mode = #tpu.pipeline_mode<synchronous>, transform_indices = @transform_4, window_bounds = array<i64: 4, 16, 16>}, {transform_indices = @transform_5, window_bounds = array<i64: 1, 4, 128>}, {transform_indices = @transform_6, window_bounds = array<i64: 1, 8, 128>}]} {
    %c0 = arith.constant 0 : index
    %c0_0 = arith.constant 0 : index
    %c0_1 = arith.constant 0 : index
    %0 = vector.load %arg1[%c0, %c0_0, %c0_1] : memref<1x16x32xf32, #tpu.memory_space<vmem>>, vector<1x16x32xf32>
    %1 = vector.shape_cast %0 : vector<1x16x32xf32> to vector<16x32xf32>
    %c0_2 = arith.constant 0 : index
    %c0_3 = arith.constant 0 : index
    %2 = vector.load %arg2[%c0_2, %c0_3] : memref<32x96xf32, #tpu.memory_space<vmem>>, vector<32x96xf32>
    %c0_4 = arith.constant 0 : index
    %c0_5 = arith.constant 0 : index
    %3 = vector.load %arg3[%c0_4, %c0_5] : memref<32x32xf32, #tpu.memory_space<vmem>>, vector<32x32xf32>
    %cst = arith.constant dense<0.000000e+00> : vector<16x96xf32>
    %4 = tpu.matmul %1, %2, %cst {dimension_numbers = #tpu.dot_dimension_numbers<[1], [0], [0], [1], [0, 0, 1, 1], [], []>} : vector<16x32xf32>, vector<32x96xf32>, vector<16x96xf32> -> vector<16x96xf32>
    %cst_6 = arith.constant 0.000000e+00 : f32
    %5 = vector.broadcast %cst_6 : f32 to vector<16x32xf32>
    %6 = vector.extract_strided_slice %4 {offsets = [0, 0], sizes = [16, 8], strides = [1, 1]} : vector<16x96xf32> to vector<16x8xf32>
    %7 = vector.extract_strided_slice %4 {offsets = [0, 32], sizes = [16, 8], strides = [1, 1]} : vector<16x96xf32> to vector<16x8xf32>
    %8 = vector.extract_strided_slice %4 {offsets = [0, 64], sizes = [16, 8], strides = [1, 1]} : vector<16x96xf32> to vector<16x8xf32>
    %9 = tpu.transpose %7, [1, 0] : vector<16x8xf32> -> vector<8x16xf32>
    %cst_7 = arith.constant dense<0.000000e+00> : vector<16x16xf32>
    %10 = tpu.matmul %6, %9, %cst_7 {dimension_numbers = #tpu.dot_dimension_numbers<[1], [0], [0], [1], [0, 0, 1, 1], [], []>} : vector<16x8xf32>, vector<8x16xf32>, vector<16x16xf32> -> vector<16x16xf32>
    %cst_8 = arith.constant 0.353553385 : f32
    %11 = vector.broadcast %cst_8 : f32 to vector<16x16xf32>
    %12 = arith.mulf %10, %11 : vector<16x16xf32>
    %cst_9 = arith.constant dense<0xFF800000> : vector<16xf32>
    %13 = vector.multi_reduction <maximumf>, %12, %cst_9 [1] : vector<16x16xf32> to vector<16xf32>
    %14 = vector.shape_cast %13 : vector<16xf32> to vector<16x1xf32>
    %15 = vector.broadcast %14 : vector<16x1xf32> to vector<16x16xf32>
    %16 = arith.subf %12, %15 : vector<16x16xf32>
    %17 = math.exp %16 : vector<16x16xf32>
    %cst_10 = arith.constant dense<0.000000e+00> : vector<16xf32>
    %18 = vector.multi_reduction <add>, %17, %cst_10 [1] : vector<16x16xf32> to vector<16xf32>
    %19 = vector.shape_cast %18 : vector<16xf32> to vector<16x1xf32>
    %20 = tpu.reciprocal %19 {approx = true} : vector<16x1xf32> -> vector<16x1xf32>
    %21 = arith.mulf %19, %20 : vector<16x1xf32>
    %cst_11 = arith.constant 2.000000e+00 : f32
    %22 = vector.broadcast %cst_11 : f32 to vector<16x1xf32>
    %23 = arith.subf %22, %21 : vector<16x1xf32>
    %24 = arith.mulf %20, %23 : vector<16x1xf32>
    %25 = vector.broadcast %24 : vector<16x1xf32> to vector<16x16xf32>
    %26 = arith.mulf %17, %25 : vector<16x16xf32>
    %27 = vector.extract_strided_slice %26 {offsets = [0, 0], sizes = [8, 16], strides = [1, 1]} : vector<16x16xf32> to vector<8x16xf32>
    %28 = vector.extract_strided_slice %26 {offsets = [8, 0], sizes = [8, 16], strides = [1, 1]} : vector<16x16xf32> to vector<8x16xf32>
    %c0_12 = arith.constant 0 : index
    %c0_13 = arith.constant 0 : index
    %c0_14 = arith.constant 0 : index
    %29 = vector.load %arg5[%c0_12, %c0_13, %c0_14] : memref<4x16x16xf32, #tpu.memory_space<vmem>>, vector<1x16x16xf32>
    %30 = vector.shape_cast %29 : vector<1x16x16xf32> to vector<16x16xf32>
    %31 = arith.addf %12, %30 : vector<16x16xf32>
    %cst_15 = arith.constant dense<0xFF800000> : vector<16xf32>
    %32 = vector.multi_reduction <maximumf>, %31, %cst_15 [1] : vector<16x16xf32> to vector<16xf32>
    %33 = vector.shape_cast %32 : vector<16xf32> to vector<16x1xf32>
    %34 = vector.broadcast %33 : vector<16x1xf32> to vector<16x16xf32>
    %35 = arith.subf %31, %34 : vector<16x16xf32>
    %36 = math.exp %35 : vector<16x16xf32>
    %cst_16 = arith.constant dense<0.000000e+00> : vector<16xf32>
    %37 = vector.multi_reduction <add>, %36, %cst_16 [1] : vector<16x16xf32> to vector<16xf32>
    %38 = vector.shape_cast %37 : vector<16xf32> to vector<16x1xf32>
    %39 = tpu.reciprocal %38 {approx = true} : vector<16x1xf32> -> vector<16x1xf32>
    %40 = arith.mulf %38, %39 : vector<16x1xf32>
    %cst_17 = arith.constant 2.000000e+00 : f32
    %41 = vector.broadcast %cst_17 : f32 to vector<16x1xf32>
    %42 = arith.subf %41, %40 : vector<16x1xf32>
    %43 = arith.mulf %39, %42 : vector<16x1xf32>
    %44 = vector.broadcast %43 : vector<16x1xf32> to vector<16x16xf32>
    %45 = arith.mulf %36, %44 : vector<16x16xf32>
    %cst_18 = arith.constant dense<0.000000e+00> : vector<16x8xf32>
    %46 = tpu.matmul %45, %8, %cst_18 {dimension_numbers = #tpu.dot_dimension_numbers<[1], [0], [0], [1], [0, 0, 1, 1], [], []>} : vector<16x16xf32>, vector<16x8xf32>, vector<16x8xf32> -> vector<16x8xf32>
    %47 = vector.extract_strided_slice %3 {offsets = [0, 0], sizes = [8, 32], strides = [1, 1]} : vector<32x32xf32> to vector<8x32xf32>
    %cst_19 = arith.constant dense<0.000000e+00> : vector<16x32xf32>
    %48 = tpu.matmul %46, %47, %cst_19 {dimension_numbers = #tpu.dot_dimension_numbers<[1], [0], [0], [1], [0, 0, 1, 1], [], []>} : vector<16x8xf32>, vector<8x32xf32>, vector<16x32xf32> -> vector<16x32xf32>
    %49 = arith.addf %5, %48 : vector<16x32xf32>
    %50 = vector.extract_strided_slice %4 {offsets = [0, 8], sizes = [16, 8], strides = [1, 1]} : vector<16x96xf32> to vector<16x8xf32>
    %51 = vector.extract_strided_slice %4 {offsets = [0, 40], sizes = [16, 8], strides = [1, 1]} : vector<16x96xf32> to vector<16x8xf32>
    %52 = vector.extract_strided_slice %4 {offsets = [0, 72], sizes = [16, 8], strides = [1, 1]} : vector<16x96xf32> to vector<16x8xf32>
    %53 = tpu.transpose %51, [1, 0] : vector<16x8xf32> -> vector<8x16xf32>
    %cst_20 = arith.constant dense<0.000000e+00> : vector<16x16xf32>
    %54 = tpu.matmul %50, %53, %cst_20 {dimension_numbers = #tpu.dot_dimension_numbers<[1], [0], [0], [1], [0, 0, 1, 1], [], []>} : vector<16x8xf32>, vector<8x16xf32>, vector<16x16xf32> -> vector<16x16xf32>
    %cst_21 = arith.constant 0.353553385 : f32
    %55 = vector.broadcast %cst_21 : f32 to vector<16x16xf32>
    %56 = arith.mulf %54, %55 : vector<16x16xf32>
    %cst_22 = arith.constant dense<0xFF800000> : vector<16xf32>
    %57 = vector.multi_reduction <maximumf>, %56, %cst_22 [1] : vector<16x16xf32> to vector<16xf32>
    %58 = vector.shape_cast %57 : vector<16xf32> to vector<16x1xf32>
    %59 = vector.broadcast %58 : vector<16x1xf32> to vector<16x16xf32>
    %60 = arith.subf %56, %59 : vector<16x16xf32>
    %61 = math.exp %60 : vector<16x16xf32>
    %cst_23 = arith.constant dense<0.000000e+00> : vector<16xf32>
    %62 = vector.multi_reduction <add>, %61, %cst_23 [1] : vector<16x16xf32> to vector<16xf32>
    %63 = vector.shape_cast %62 : vector<16xf32> to vector<16x1xf32>
    %64 = tpu.reciprocal %63 {approx = true} : vector<16x1xf32> -> vector<16x1xf32>
    %65 = arith.mulf %63, %64 : vector<16x1xf32>
    %cst_24 = arith.constant 2.000000e+00 : f32
    %66 = vector.broadcast %cst_24 : f32 to vector<16x1xf32>
    %67 = arith.subf %66, %65 : vector<16x1xf32>
    %68 = arith.mulf %64, %67 : vector<16x1xf32>
    %69 = vector.broadcast %68 : vector<16x1xf32> to vector<16x16xf32>
    %70 = arith.mulf %61, %69 : vector<16x16xf32>
    %71 = vector.extract_strided_slice %70 {offsets = [0, 0], sizes = [8, 16], strides = [1, 1]} : vector<16x16xf32> to vector<8x16xf32>
    %72 = vector.extract_strided_slice %70 {offsets = [8, 0], sizes = [8, 16], strides = [1, 1]} : vector<16x16xf32> to vector<8x16xf32>
    %c1 = arith.constant 1 : index
    %c0_25 = arith.constant 0 : index
    %c0_26 = arith.constant 0 : index
    %73 = vector.load %arg5[%c1, %c0_25, %c0_26] : memref<4x16x16xf32, #tpu.memory_space<vmem>>, vector<1x16x16xf32>
    %74 = vector.shape_cast %73 : vector<1x16x16xf32> to vector<16x16xf32>
    %75 = arith.addf %56, %74 : vector<16x16xf32>
    %cst_27 = arith.constant dense<0xFF800000> : vector<16xf32>
    %76 = vector.multi_reduction <maximumf>, %75, %cst_27 [1] : vector<16x16xf32> to vector<16xf32>
    %77 = vector.shape_cast %76 : vector<16xf32> to vector<16x1xf32>
    %78 = vector.broadcast %77 : vector<16x1xf32> to vector<16x16xf32>
    %79 = arith.subf %75, %78 : vector<16x16xf32>
    %80 = math.exp %79 : vector<16x16xf32>
    %cst_28 = arith.constant dense<0.000000e+00> : vector<16xf32>
    %81 = vector.multi_reduction <add>, %80, %cst_28 [1] : vector<16x16xf32> to vector<16xf32>
    %82 = vector.shape_cast %81 : vector<16xf32> to vector<16x1xf32>
    %83 = tpu.reciprocal %82 {approx = true} : vector<16x1xf32> -> vector<16x1xf32>
    %84 = arith.mulf %82, %83 : vector<16x1xf32>
    %cst_29 = arith.constant 2.000000e+00 : f32
    %85 = vector.broadcast %cst_29 : f32 to vector<16x1xf32>
    %86 = arith.subf %85, %84 : vector<16x1xf32>
    %87 = arith.mulf %83, %86 : vector<16x1xf32>
    %88 = vector.broadcast %87 : vector<16x1xf32> to vector<16x16xf32>
    %89 = arith.mulf %80, %88 : vector<16x16xf32>
    %cst_30 = arith.constant dense<0.000000e+00> : vector<16x8xf32>
    %90 = tpu.matmul %89, %52, %cst_30 {dimension_numbers = #tpu.dot_dimension_numbers<[1], [0], [0], [1], [0, 0, 1, 1], [], []>} : vector<16x16xf32>, vector<16x8xf32>, vector<16x8xf32> -> vector<16x8xf32>
    %91 = vector.extract_strided_slice %3 {offsets = [8, 0], sizes = [8, 32], strides = [1, 1]} : vector<32x32xf32> to vector<8x32xf32>
    %cst_31 = arith.constant dense<0.000000e+00> : vector<16x32xf32>
    %92 = tpu.matmul %90, %91, %cst_31 {dimension_numbers = #tpu.dot_dimension_numbers<[1], [0], [0], [1], [0, 0, 1, 1], [], []>} : vector<16x8xf32>, vector<8x32xf32>, vector<16x32xf32> -> vector<16x32xf32>
    %93 = arith.addf %49, %92 : vector<16x32xf32>
    %94 = vector.extract_strided_slice %4 {offsets = [0, 16], sizes = [16, 8], strides = [1, 1]} : vector<16x96xf32> to vector<16x8xf32>
    %95 = vector.extract_strided_slice %4 {offsets = [0, 48], sizes = [16, 8], strides = [1, 1]} : vector<16x96xf32> to vector<16x8xf32>
    %96 = vector.extract_strided_slice %4 {offsets = [0, 80], sizes = [16, 8], strides = [1, 1]} : vector<16x96xf32> to vector<16x8xf32>
    %97 = tpu.transpose %95, [1, 0] : vector<16x8xf32> -> vector<8x16xf32>
    %cst_32 = arith.constant dense<0.000000e+00> : vector<16x16xf32>
    %98 = tpu.matmul %94, %97, %cst_32 {dimension_numbers = #tpu.dot_dimension_numbers<[1], [0], [0], [1], [0, 0, 1, 1], [], []>} : vector<16x8xf32>, vector<8x16xf32>, vector<16x16xf32> -> vector<16x16xf32>
    %cst_33 = arith.constant 0.353553385 : f32
    %99 = vector.broadcast %cst_33 : f32 to vector<16x16xf32>
    %100 = arith.mulf %98, %99 : vector<16x16xf32>
    %cst_34 = arith.constant dense<0xFF800000> : vector<16xf32>
    %101 = vector.multi_reduction <maximumf>, %100, %cst_34 [1] : vector<16x16xf32> to vector<16xf32>
    %102 = vector.shape_cast %101 : vector<16xf32> to vector<16x1xf32>
    %103 = vector.broadcast %102 : vector<16x1xf32> to vector<16x16xf32>
    %104 = arith.subf %100, %103 : vector<16x16xf32>
    %105 = math.exp %104 : vector<16x16xf32>
    %cst_35 = arith.constant dense<0.000000e+00> : vector<16xf32>
    %106 = vector.multi_reduction <add>, %105, %cst_35 [1] : vector<16x16xf32> to vector<16xf32>
    %107 = vector.shape_cast %106 : vector<16xf32> to vector<16x1xf32>
    %108 = tpu.reciprocal %107 {approx = true} : vector<16x1xf32> -> vector<16x1xf32>
    %109 = arith.mulf %107, %108 : vector<16x1xf32>
    %cst_36 = arith.constant 2.000000e+00 : f32
    %110 = vector.broadcast %cst_36 : f32 to vector<16x1xf32>
    %111 = arith.subf %110, %109 : vector<16x1xf32>
    %112 = arith.mulf %108, %111 : vector<16x1xf32>
    %113 = vector.broadcast %112 : vector<16x1xf32> to vector<16x16xf32>
    %114 = arith.mulf %105, %113 : vector<16x16xf32>
    %115 = vector.extract_strided_slice %114 {offsets = [0, 0], sizes = [8, 16], strides = [1, 1]} : vector<16x16xf32> to vector<8x16xf32>
    %116 = vector.extract_strided_slice %114 {offsets = [8, 0], sizes = [8, 16], strides = [1, 1]} : vector<16x16xf32> to vector<8x16xf32>
    %c2 = arith.constant 2 : index
    %c0_37 = arith.constant 0 : index
    %c0_38 = arith.constant 0 : index
    %117 = vector.load %arg5[%c2, %c0_37, %c0_38] : memref<4x16x16xf32, #tpu.memory_space<vmem>>, vector<1x16x16xf32>
    %118 = vector.shape_cast %117 : vector<1x16x16xf32> to vector<16x16xf32>
    %119 = arith.addf %100, %118 : vector<16x16xf32>
    %cst_39 = arith.constant dense<0xFF800000> : vector<16xf32>
    %120 = vector.multi_reduction <maximumf>, %119, %cst_39 [1] : vector<16x16xf32> to vector<16xf32>
    %121 = vector.shape_cast %120 : vector<16xf32> to vector<16x1xf32>
    %122 = vector.broadcast %121 : vector<16x1xf32> to vector<16x16xf32>
    %123 = arith.subf %119, %122 : vector<16x16xf32>
    %124 = math.exp %123 : vector<16x16xf32>
    %cst_40 = arith.constant dense<0.000000e+00> : vector<16xf32>
    %125 = vector.multi_reduction <add>, %124, %cst_40 [1] : vector<16x16xf32> to vector<16xf32>
    %126 = vector.shape_cast %125 : vector<16xf32> to vector<16x1xf32>
    %127 = tpu.reciprocal %126 {approx = true} : vector<16x1xf32> -> vector<16x1xf32>
    %128 = arith.mulf %126, %127 : vector<16x1xf32>
    %cst_41 = arith.constant 2.000000e+00 : f32
    %129 = vector.broadcast %cst_41 : f32 to vector<16x1xf32>
    %130 = arith.subf %129, %128 : vector<16x1xf32>
    %131 = arith.mulf %127, %130 : vector<16x1xf32>
    %132 = vector.broadcast %131 : vector<16x1xf32> to vector<16x16xf32>
    %133 = arith.mulf %124, %132 : vector<16x16xf32>
    %cst_42 = arith.constant dense<0.000000e+00> : vector<16x8xf32>
    %134 = tpu.matmul %133, %96, %cst_42 {dimension_numbers = #tpu.dot_dimension_numbers<[1], [0], [0], [1], [0, 0, 1, 1], [], []>} : vector<16x16xf32>, vector<16x8xf32>, vector<16x8xf32> -> vector<16x8xf32>
    %135 = vector.extract_strided_slice %3 {offsets = [16, 0], sizes = [8, 32], strides = [1, 1]} : vector<32x32xf32> to vector<8x32xf32>
    %cst_43 = arith.constant dense<0.000000e+00> : vector<16x32xf32>
    %136 = tpu.matmul %134, %135, %cst_43 {dimension_numbers = #tpu.dot_dimension_numbers<[1], [0], [0], [1], [0, 0, 1, 1], [], []>} : vector<16x8xf32>, vector<8x32xf32>, vector<16x32xf32> -> vector<16x32xf32>
    %137 = arith.addf %93, %136 : vector<16x32xf32>
    %138 = vector.extract_strided_slice %4 {offsets = [0, 24], sizes = [16, 8], strides = [1, 1]} : vector<16x96xf32> to vector<16x8xf32>
    %139 = vector.extract_strided_slice %4 {offsets = [0, 56], sizes = [16, 8], strides = [1, 1]} : vector<16x96xf32> to vector<16x8xf32>
    %140 = vector.extract_strided_slice %4 {offsets = [0, 88], sizes = [16, 8], strides = [1, 1]} : vector<16x96xf32> to vector<16x8xf32>
    %141 = tpu.transpose %139, [1, 0] : vector<16x8xf32> -> vector<8x16xf32>
    %cst_44 = arith.constant dense<0.000000e+00> : vector<16x16xf32>
    %142 = tpu.matmul %138, %141, %cst_44 {dimension_numbers = #tpu.dot_dimension_numbers<[1], [0], [0], [1], [0, 0, 1, 1], [], []>} : vector<16x8xf32>, vector<8x16xf32>, vector<16x16xf32> -> vector<16x16xf32>
    %cst_45 = arith.constant 0.353553385 : f32
    %143 = vector.broadcast %cst_45 : f32 to vector<16x16xf32>
    %144 = arith.mulf %142, %143 : vector<16x16xf32>
    %cst_46 = arith.constant dense<0xFF800000> : vector<16xf32>
    %145 = vector.multi_reduction <maximumf>, %144, %cst_46 [1] : vector<16x16xf32> to vector<16xf32>
    %146 = vector.shape_cast %145 : vector<16xf32> to vector<16x1xf32>
    %147 = vector.broadcast %146 : vector<16x1xf32> to vector<16x16xf32>
    %148 = arith.subf %144, %147 : vector<16x16xf32>
    %149 = math.exp %148 : vector<16x16xf32>
    %cst_47 = arith.constant dense<0.000000e+00> : vector<16xf32>
    %150 = vector.multi_reduction <add>, %149, %cst_47 [1] : vector<16x16xf32> to vector<16xf32>
    %151 = vector.shape_cast %150 : vector<16xf32> to vector<16x1xf32>
    %152 = tpu.reciprocal %151 {approx = true} : vector<16x1xf32> -> vector<16x1xf32>
    %153 = arith.mulf %151, %152 : vector<16x1xf32>
    %cst_48 = arith.constant 2.000000e+00 : f32
    %154 = vector.broadcast %cst_48 : f32 to vector<16x1xf32>
    %155 = arith.subf %154, %153 : vector<16x1xf32>
    %156 = arith.mulf %152, %155 : vector<16x1xf32>
    %157 = vector.broadcast %156 : vector<16x1xf32> to vector<16x16xf32>
    %158 = arith.mulf %149, %157 : vector<16x16xf32>
    %159 = vector.extract_strided_slice %158 {offsets = [0, 0], sizes = [8, 16], strides = [1, 1]} : vector<16x16xf32> to vector<8x16xf32>
    %160 = vector.extract_strided_slice %158 {offsets = [8, 0], sizes = [8, 16], strides = [1, 1]} : vector<16x16xf32> to vector<8x16xf32>
    %c3 = arith.constant 3 : index
    %c0_49 = arith.constant 0 : index
    %c0_50 = arith.constant 0 : index
    %161 = vector.load %arg5[%c3, %c0_49, %c0_50] : memref<4x16x16xf32, #tpu.memory_space<vmem>>, vector<1x16x16xf32>
    %162 = vector.shape_cast %161 : vector<1x16x16xf32> to vector<16x16xf32>
    %163 = arith.addf %144, %162 : vector<16x16xf32>
    %cst_51 = arith.constant dense<0xFF800000> : vector<16xf32>
    %164 = vector.multi_reduction <maximumf>, %163, %cst_51 [1] : vector<16x16xf32> to vector<16xf32>
    %165 = vector.shape_cast %164 : vector<16xf32> to vector<16x1xf32>
    %166 = vector.broadcast %165 : vector<16x1xf32> to vector<16x16xf32>
    %167 = arith.subf %163, %166 : vector<16x16xf32>
    %168 = math.exp %167 : vector<16x16xf32>
    %cst_52 = arith.constant dense<0.000000e+00> : vector<16xf32>
    %169 = vector.multi_reduction <add>, %168, %cst_52 [1] : vector<16x16xf32> to vector<16xf32>
    %170 = vector.shape_cast %169 : vector<16xf32> to vector<16x1xf32>
    %171 = tpu.reciprocal %170 {approx = true} : vector<16x1xf32> -> vector<16x1xf32>
    %172 = arith.mulf %170, %171 : vector<16x1xf32>
    %cst_53 = arith.constant 2.000000e+00 : f32
    %173 = vector.broadcast %cst_53 : f32 to vector<16x1xf32>
    %174 = arith.subf %173, %172 : vector<16x1xf32>
    %175 = arith.mulf %171, %174 : vector<16x1xf32>
    %176 = vector.broadcast %175 : vector<16x1xf32> to vector<16x16xf32>
    %177 = arith.mulf %168, %176 : vector<16x16xf32>
    %cst_54 = arith.constant dense<0.000000e+00> : vector<16x8xf32>
    %178 = tpu.matmul %177, %140, %cst_54 {dimension_numbers = #tpu.dot_dimension_numbers<[1], [0], [0], [1], [0, 0, 1, 1], [], []>} : vector<16x16xf32>, vector<16x8xf32>, vector<16x8xf32> -> vector<16x8xf32>
    %179 = vector.extract_strided_slice %3 {offsets = [24, 0], sizes = [8, 32], strides = [1, 1]} : vector<32x32xf32> to vector<8x32xf32>
    %cst_55 = arith.constant dense<0.000000e+00> : vector<16x32xf32>
    %180 = tpu.matmul %178, %179, %cst_55 {dimension_numbers = #tpu.dot_dimension_numbers<[1], [0], [0], [1], [0, 0, 1, 1], [], []>} : vector<16x8xf32>, vector<8x32xf32>, vector<16x32xf32> -> vector<16x32xf32>
    %181 = arith.addf %137, %180 : vector<16x32xf32>
    %c0_56 = arith.constant 0 : index
    %c0_57 = arith.constant 0 : index
    %182 = vector.load %arg4[%c0_56, %c0_57] : memref<1x32xf32, #tpu.memory_space<vmem>>, vector<1x32xf32>
    %183 = vector.broadcast %182 : vector<1x32xf32> to vector<16x32xf32>
    %184 = arith.addf %181, %183 : vector<16x32xf32>
    %185 = vector.extract_strided_slice %184 {offsets = [0, 0], sizes = [4, 32], strides = [1, 1]} : vector<16x32xf32> to vector<4x32xf32>
    %186 = vector.extract_strided_slice %184 {offsets = [4, 0], sizes = [4, 32], strides = [1, 1]} : vector<16x32xf32> to vector<4x32xf32>
    %187 = vector.extract_strided_slice %184 {offsets = [8, 0], sizes = [4, 32], strides = [1, 1]} : vector<16x32xf32> to vector<4x32xf32>
    %188 = vector.extract_strided_slice %184 {offsets = [12, 0], sizes = [4, 32], strides = [1, 1]} : vector<16x32xf32> to vector<4x32xf32>
    %189 = tpu.concatenate %185, %186, %187, %188 in 1 : vector<4x32xf32>, vector<4x32xf32>, vector<4x32xf32>, vector<4x32xf32> -> vector<4x128xf32>
    %c0_58 = arith.constant 0 : index
    %c0_59 = arith.constant 0 : index
    %c0_60 = arith.constant 0 : index
    %190 = vector.load %arg6[%c0_58, %c0_59, %c0_60] : memref<1x4x128xf32, #tpu.memory_space<vmem>>, vector<1x4x128xf32>
    %191 = vector.shape_cast %190 : vector<1x4x128xf32> to vector<4x128xf32>
    %192 = vector.shape_cast %189 : vector<4x128xf32> to vector<1x4x128xf32>
    tpu.vector_store %arg6[%c0_58, %c0_59, %c0_60], %192 {strides = array<i32>} : memref<1x4x128xf32, #tpu.memory_space<vmem>>, vector<1x4x128xf32>,
    %193 = tpu.concatenate %27, %28, %71, %72, %115, %116, %159, %160 in 1 : vector<8x16xf32>, vector<8x16xf32>, vector<8x16xf32>, vector<8x16xf32>, vector<8x16xf32>, vector<8x16xf32>, vector<8x16xf32>, vector<8x16xf32> -> vector<8x128xf32>
    %c0_61 = arith.constant 0 : index
    %c0_62 = arith.constant 0 : index
    %c0_63 = arith.constant 0 : index
    %194 = vector.load %arg7[%c0_61, %c0_62, %c0_63] : memref<1x8x128xf32, #tpu.memory_space<vmem>>, vector<1x8x128xf32>
    %195 = vector.shape_cast %194 : vector<1x8x128xf32> to vector<8x128xf32>
    %196 = vector.shape_cast %193 : vector<8x128xf32> to vector<1x8x128xf32>
    tpu.vector_store %arg7[%c0_61, %c0_62, %c0_63], %196 {strides = array<i32>} : memref<1x8x128xf32, #tpu.memory_space<vmem>>, vector<1x8x128xf32>,
    return
  }
  func.func @transform_0(%arg0: i32) -> (i32, i32, i32) {
    %c0_i32 = arith.constant 0 : i32
    %c0_i32_0 = arith.constant 0 : i32
    %c0_i32_1 = arith.constant 0 : i32
    return %arg0, %c0_i32, %c0_i32_0 : i32, i32, i32
  }
  func.func @transform_1(%arg0: i32) -> (i32, i32) {
    %c0_i32 = arith.constant 0 : i32
    %c0_i32_0 = arith.constant 0 : i32
    %c0_i32_1 = arith.constant 0 : i32
    return %c0_i32, %c0_i32_0 : i32, i32
  }
  func.func @transform_2(%arg0: i32) -> (i32, i32) {
    %c0_i32 = arith.constant 0 : i32
    %c0_i32_0 = arith.constant 0 : i32
    %c0_i32_1 = arith.constant 0 : i32
    return %c0_i32, %c0_i32_0 : i32, i32
  }
  func.func @transform_3(%arg0: i32) -> (i32, i32) {
    %c0_i32 = arith.constant 0 : i32
    %c0_i32_0 = arith.constant 0 : i32
    %c0_i32_1 = arith.constant 0 : i32
    return %c0_i32, %c0_i32_0 : i32, i32
  }
  func.func @transform_4(%arg0: i32) -> (i32, i32, i32) {
    %c0_i32 = arith.constant 0 : i32
    %c0_i32_0 = arith.constant 0 : i32
    %c0_i32_1 = arith.constant 0 : i32
    %c0_i32_2 = arith.constant 0 : i32
    return %c0_i32, %c0_i32_0, %c0_i32_1 : i32, i32, i32
  }
  func.func @transform_5(%arg0: i32) -> (i32, i32, i32) {
    %c0_i32 = arith.constant 0 : i32
    %c0_i32_0 = arith.constant 0 : i32
    %c0_i32_1 = arith.constant 0 : i32
    return %arg0, %c0_i32, %c0_i32_0 : i32, i32, i32
  }
  func.func @transform_6(%arg0: i32) -> (i32, i32, i32) {
    %c0_i32 = arith.constant 0 : i32
    %c0_i32_0 = arith.constant 0 : i32
    %c0_i32_1 = arith.constant 0 : i32
    return %arg0, %c0_i32, %c0_i32_0 : i32, i32, i32
  }
}

</mosaic_0001>

<bundles_post_ra>
// kernel: tpu_custom_call.1
= control target key start
LH: loop header
LB: loop body
LE: loop exit
PB: predicated region body
PF: predicated region fallthrough
CT: control target
= control target key end

     0   :  { %12 = vsyncpa [#allocation3], 0  ;;  %s3166_s0 = inlined_call_operand.hbm [shape: f32[2,16,32], index: 0, kind: input, shape index: {}]   ;;  %s3167_s1 = inlined_call_operand.hbm [shape: f32[32,96], index: 1, kind: input, shape index: {}]   ;;  %s3168_s2 = inlined_call_operand.hbm [shape: f32[32,32], index: 2, kind: input, shape index: {}]   ;;  %s3169_s3 = inlined_call_operand.vmem [shape: f32[1,32], index: 3, kind: input, shape index: {}]   ;;  %s3170_s4 = inlined_call_operand.hbm [shape: f32[4,16,16], index: 4, kind: input, shape index: {}]   ;;  %s3171_s5 = inlined_call_operand.hbm [shape: f32[2,4,128], index: 5, kind: output, shape index: {0}]   ;;  %s3172_s6 = inlined_call_operand.hbm [shape: f32[2,8,128], index: 6, kind: output, shape index: {1}]  }
   0x1   :  { %14 = vsyncpa [#allocation3 + $0x1], 0 }
   0x2   :  { %15 = vsyncpa [#allocation6], 0 }
   0x3   :  { %16 = vsyncpa [#allocation9], 0 }
   0x4   :  { %17 = vsyncpa [#allocation4], 0 }
   0x5   :  { %19 = vsyncpa [#allocation4 + $0x1], 0 }
   0x6   :  { %20 = vsyncpa [#allocation12], 0 }
   0x7   :  { %22 = vsyncpa [#allocation12 + $0x1], 0  ;;  %s2666_s21 = smov 0   ;;  %s2668_s22 = smov 0  }
   0x8   :  { %s2670_s23 = smov 0   ;;  %s2672_s24 = smov 0  }
   0x9 LB: > { %s2687_s25 = sadd.s32 4294967295, %s2608_s24   ;;  %s1938_s26 = sadd.s32 4294967294, %s2608_s24   ;;  %s2608_s24 = sphi %s2672_s24, %s3197_s24   ;;  %s2604_s23 = sphi %s2670_s23, %s3196_s23   ;;  %s2600_s22 = sphi %s2668_s22, %s3195_s22   ;;  %s2596_s21 = sphi %s2666_s21, %s3194_s21  }
   0xa   : > { %p48_p0 = scmp.ne.s32.totalorder %s2600_s22, %s2596_s21  ;;  %p3173_p1 = scmp.eq.s32.totalorder %s2687_s25, 0 }
   0xb   : > { %p162_p3 = scmp.eq.s32.totalorder %s1938_s26, 1  ;;  %p1939_p5 = scmp.ge.s32.totalorder %s2608_s24, 1 }
   0xc   : > { %p2696_p4 = por %p3173_p1, %p48_p0  ;;  %p195_p7 = scmp.lt.s32.totalorder %s2608_s24, 3 }
   0xd   : > { %p2701_p6 = por %p162_p3, %p48_p0  ;;  %s2610_s30 = smov [#allocation5]  }
   0xe   : > { %s3176_s27 = scalar_select %p2696_p4, 1, 0 }
   0xf   : > { %s3177_s28 = scalar_select %p2701_p6, 1, 0 }
  0x10   : > { %p2706_p8 = pnand %p1939_p5, %p195_p7  ;;  %s207_s7 = sshll.u32 %s2610_s30, 4  ;;  %s2710_s7 = int_to_ptr.vmem [resolvable:$true] %s207_s7 }
  0x11   : > { %s2611_s9 = smov [#allocation7]   ;;  %s2612_s11 = smov [#allocation8]  }
  0x12   : > { %s3178_s29 = scalar_select %p2706_p8, 1, 0 }
  0x13   : > { %p2205_p9 = pneg %p2706_p8  ;;  %s220_s10 = sshll.u32 %s2611_s9, 4  ;;  %s2721_s10 = int_to_ptr.vmem [resolvable:$true] %s220_s10 }
  0x14   : > { %s2723_s12 = sshll.u32 %s2612_s11, 4  ;;  %s2388_s15 = scalar_lea.hbm %s3167_s1, 512  ;;  %s237_s12 = int_to_ptr.vmem [resolvable:$true] %s2723_s12 }
  0x15   : > { %p2717_p11 = pnand %p2205_p9, %p3173_p1  ;;  %p2389_p12 = scmp.ne.s32.totalorder %s3167_s1, %s2388_s15 }
  0x16   : > { %p2395_p5 = scmp.lt.u32.totalorder %s2388_s15, %s3167_s1 }
  0x17   : > { %p2733_p13 = pneg %p2717_p11 }
  0x19   : > { %p2391_p0 = pnand %p2733_p13, %p2389_p12 }
  0x1b   : > { %p2392_p3 = pneg %p2391_p0 }
  0x1d   : > { %p2397_p7 = pnand %p2395_p5, %p2392_p3 }
  0x1f   : > { %2400 = shalt.err (!%p2397_p7)
}
  0x20   : > { %s2401_s26 = scalar_lea.vmem %s2710_s7, 512  ;;  %p2409_p2 = scmp.lt.s32.totalorder %s2710_s7, %s2710_s7 }
  0x21   : > { %p2402_p9 = scmp.ne.s32.totalorder %s2710_s7, %s2401_s26  ;;  %p2410_p6 = scmp.lt.s32.totalorder %s2401_s26, %s2401_s26 }
  0x23   : > { %p2404_p10 = pnand %p2402_p9, %p2733_p13  ;;  %p2411_p12 = por %p2410_p6, %p2409_p2 }
  0x25   : > { %p2405_p1 = pneg %p2404_p10 }
  0x27   : > { %p2412_p0 = pnand %p2411_p12, %p2405_p1 }
  0x29   : > { %2415 = shalt.err (!%p2412_p0)
}
  0x2a   : > { %s2613_s30 = smov 128   ;;  %s2614_s9 = smov 8  }
  0x2b   : > { %2208 = dma.hbm_to_vmem [thread:$0]  (!%p2717_p11), %s3167_s1, 512, %s2710_s7, [#allocation6], %s2613_s30, %s2613_s30, %s2614_s9  }
  0x2c   : > { %s2416_s16 = scalar_lea.hbm %s3168_s2, 512 }
  0x2d   : > { %p2417_p1 = scmp.ne.s32.totalorder %s3168_s2, %s2416_s16  ;;  %p2423_p10 = scmp.lt.u32.totalorder %s2416_s16, %s3168_s2 }
  0x2f   : > { %p2419_p2 = pnand %p2417_p1, %p2733_p13 }
  0x31   : > { %p2420_p6 = pneg %p2419_p2 }
  0x33   : > { %p2425_p3 = pnand %p2423_p10, %p2420_p6 }
  0x35   : > { %2428 = shalt.err (!%p2425_p3)
}
  0x36   : > { %s2429_s7 = scalar_lea.vmem %s2721_s10, 512  ;;  %p2437_p12 = scmp.lt.s32.totalorder %s2721_s10, %s2721_s10 }
  0x37   : > { %p2430_p5 = scmp.ne.s32.totalorder %s2721_s10, %s2429_s7  ;;  %p2438_p0 = scmp.lt.s32.totalorder %s2429_s7, %s2429_s7 }
  0x39   : > { %p2432_p7 = pnand %p2430_p5, %p2733_p13  ;;  %p2439_p1 = por %p2438_p0, %p2437_p12 }
  0x3b   : > { %p2433_p9 = pneg %p2432_p7 }
  0x3d   : > { %p2440_p2 = pnand %p2439_p1, %p2433_p9 }
  0x3f   : > { %2443 = shalt.err (!%p2440_p2)
}
  0x40   : > { %2211 = dma.hbm_to_vmem [thread:$0]  (!%p2717_p11), %s3168_s2, 512, %s2721_s10, [#allocation6], %s2613_s30, %s2613_s30, %s2614_s9  }
  0x41   : > { %s2444_s16 = scalar_lea.hbm %s3170_s4, 1024 }
  0x42   : > { %p2445_p6 = scmp.ne.s32.totalorder %s3170_s4, %s2444_s16  ;;  %p2451_p5 = scmp.lt.u32.totalorder %s2444_s16, %s3170_s4 }
  0x44   : > { %p2447_p10 = pnand %p2445_p6, %p2733_p13 }
  0x46   : > { %p2448_p3 = pneg %p2447_p10 }
  0x48   : > { %p2453_p7 = pnand %p2451_p5, %p2448_p3 }
  0x4a   : > { %2456 = shalt.err (!%p2453_p7)
}
  0x4b   : > { %s2457_s7 = scalar_lea.vmem %s237_s12, 1024  ;;  %p2465_p1 = scmp.lt.s32.totalorder %s237_s12, %s237_s12 }
  0x4c   : > { %p2458_p9 = scmp.ne.s32.totalorder %s237_s12, %s2457_s7  ;;  %p2466_p2 = scmp.lt.s32.totalorder %s2457_s7, %s2457_s7 }
  0x4e   : > { %p2460_p12 = pnand %p2458_p9, %p2733_p13  ;;  %p2467_p4 = por %p2466_p2, %p2465_p1 }
  0x50   : > { %p2461_p0 = pneg %p2460_p12 }
  0x52   : > { %p2468_p8 = pnand %p2467_p4, %p2461_p0 }
  0x54   : > { %2471 = shalt.err (!%p2468_p8)
}
  0x55   : > { %2214 = dma.hbm_to_vmem [thread:$0]  (!%p2717_p11), %s3170_s4, 1024, %s237_s12, [#allocation9], %s2613_s30, %s2613_s30, %s2614_s9  }
  0x56   : > { %s2806_s18 = sadd.s32 1, %s2608_s24   ;;  %s35_s13 = sadd.s32 1, %s2604_s23 }
  0x57   : > { %s32_s8 = ssub.s32 %s2608_s24, %s2806_s18  ;;  %p42_p8 = scmp.ne.s32.totalorder %s2604_s23, %s2600_s22 }
  0x58   : > { %p33_p4 = scmp.eq.s32.totalorder %s32_s8, 0  ;;  %p43_p13 = scmp.eq.s32.totalorder %s2608_s24, 0 }
  0x59   : > { %p2229_p6 = scmp.lt.s32.totalorder %s2608_s24, 2  ;;  %p3181_p3 = scmp.eq.s32.totalorder %s2687_s25, 1 }
  0x5a   : > { %s2816_s14 = scalar_select %p33_p4, %s2604_s23, %s35_s13  }
  0x5b   : > { %p44_p10 = por %p43_p13, %p42_p8  ;;  %p2820_p5 = por %p3181_p3, %p42_p8 }
  0x5c   : > { %s250_s16 = sand.u32 1, %s2604_s23   ;;  %s1995_s17 = sshll.u32 %s2608_s24, 8 }
  0x5d   : > { %s1944_s12 = sshll.u32 %s250_s16, 4  ;;  %s2829_s26 = scalar_lea.hbm %s3166_s0, %s1995_s17 }
  0x5e   : > { %s254_s7 = scalar_lea.vmem [#allocation2], %s1944_s12  ;;  %p2831_p11 = pnand %p2229_p6, %p44_p10 }
  0x5f   : > { %s261_s10 = sshll.u32 %s254_s7, 4  ;;  %s2837_s8 = scalar_lea.sflag [#allocation3], %s250_s16  ;;  %s2835_s10 = int_to_ptr.vmem [resolvable:$true] %s261_s10 }
  0x60   : > { %s2472_s13 = scalar_lea.hbm %s2829_s26, 256  ;;  %p2474_p9 = pneg %p2831_p11 }
  0x61   : > { %p2473_p7 = scmp.ne.s32.totalorder %s2829_s26, %s2472_s13  ;;  %s2477_s19 = scalar_lea.hbm %s3166_s0, 512 }
  0x62   : > { %p2478_p1 = scmp.lt.u32.totalorder %s2829_s26, %s3166_s0  ;;  %p2479_p2 = scmp.lt.u32.totalorder %s2477_s19, %s2472_s13 }
  0x63   : > { %p2475_p12 = pnand %p2474_p9, %p2473_p7  ;;  %p2481_p8 = scmp.lt.u32.totalorder %s2472_s13, %s2829_s26 }
  0x64   : > { %p2480_p4 = por %p2479_p2, %p2478_p1 }
  0x65   : > { %p2476_p0 = pneg %p2475_p12 }
  0x66   : > { %p2482_p13 = por %p2481_p8, %p2480_p4 }
  0x68   : > { %p2483_p6 = pnand %p2482_p13, %p2476_p0 }
  0x6a   : > { %2486 = shalt.err (!%p2483_p6)
}
  0x6b   : > { %s2487_s16 = scalar_lea.vmem %s2835_s10, 256  ;;  %s2615_s17 = smov [#allocation2]  }
  0x6c   : > { %p2488_p10 = scmp.ne.s32.totalorder %s2835_s10, %s2487_s16  ;;  %s2492_s12 = sshll.u32 %s2615_s17, 4  ;;  %s2493_s12 = int_to_ptr.vmem [resolvable:$false] %s2492_s12 }
  0x6d   : > { %s2494_s20 = scalar_lea.vmem %s2493_s12, 512  ;;  %p2495_p12 = scmp.lt.s32.totalorder %s2835_s10, %s2493_s12 }
  0x6e   : > { %p2490_p3 = pnand %p2488_p10, %p2474_p9  ;;  %p2496_p1 = scmp.lt.s32.totalorder %s2494_s20, %s2487_s16 }
  0x70   : > { %p2491_p7 = pneg %p2490_p3  ;;  %p2497_p2 = por %p2496_p1, %p2495_p12 }
  0x72   : > { %p2498_p4 = pnand %p2497_p2, %p2491_p7 }
  0x74   : > { %2501 = shalt.err (!%p2498_p4)
}
  0x75   : > { %2218 = dma.hbm_to_vmem [thread:$0]  (!%p2831_p11), %s2829_s26, 256, %s2835_s10, %s2837_s8, %s2613_s30, %s2613_s30, %s2614_s9  }
  0x76   : > { %p3184_p9 = scmp.ne.s32.totalorder %s3178_s29, 0 }
  0x77   : > { %s2871_s13 = sand.u32 (!%p3184_p9), 1, %s2600_s22   ;;  %p3185_p0 = scmp.ne.s32.totalorder (!%p3184_p9), %s3176_s27, 0 }
  0x78   : > { %273 = sbr.rel (%p3184_p9) target bundleno = 2691 (0xa83), region = 40  ;;  %s1948_s19 = sshll.u32 (!%p3184_p9), %s2871_s13, 4 }
  0x79   : > { %s276_s7 = scalar_lea.sflag (!%p3184_p9), [#allocation3], %s2871_s13  ;;  %s279_s16 = scalar_lea.vmem (!%p3184_p9), [#allocation2], %s1948_s19 }
  0x7f   : > { %2575 = dma.done.wait (%p3185_p0), %s276_s7, 256  }
  0x80   : > { %2577 = vsyncadd (%p3185_p0), %s276_s7, 4294967040  ;;  %p3186_p8 = scmp.eq.s32.totalorder %s2687_s25, 0 }
  0x82   : > { %2579 = dma.done.wait (%p3186_p8), [#allocation6], 1024   ;;  %p3187_p11 = pmov %p3186_p8 }
  0x83   : > { %p3188_p13 = pmov %p3186_p8 }
  0x84   : > { %2581 = vsyncadd (%p3187_p11), [#allocation6], 4294966272 }
  0x85   : > { %2583 = dma.done.wait (%p3188_p13), [#allocation9], 1024   ;;  %p3189_p6 = pmov %p3186_p8 }
  0x86   : > { %vm335_vm0 = vcmask 261120   ;;  %v327_v0 = vld [vmem:[#allocation5] sm:$0xff]  ;;  %v328_v1 = vld [vmem:[#allocation5 + $0x8] sm:$0xff]  ;;  %v329_v2 = vld [vmem:[#allocation5 + $0x10] sm:$0xff]  ;;  %vm423_vm1 = vcmask 64512   ;;  %s2616_s27 = smov 96  }
  0x87   : > { %2585 = vsyncadd (%p3189_p6), [#allocation9], 4294966272  ;;  %v2133_v3 = vpack.c.bf16 %v328_v1, %v327_v0  ;;  %v330_v4 = vld [vmem:[#allocation5 + $0x18] sm:$0xff]  ;;  %v325_v5 = vld [vmem:[%s279_s16] sm:$0xff]  ;;  %vm509_vm3 = vcmask 130048   ;;  %s2617_s29 = smov 64  }
  0x88   : > { %v2137_v6 = vpack.c.bf16 %v330_v4, %v329_v2  ;;  %2054 = vmatprep.mubr.msk.f32.mxu0 %vm335_vm0, %v325_v5  ;;  %v326_v7 = vld [vmem:[%s279_s16 + $0x8] sm:$0xff]  ;;  %vm2903_vm2 = vmpackc.low %vm423_vm1, %vm423_vm1  ;;  %v538_v20 = vld [vmem:[#allocation8] sm:$0xff]  ;;  %s2618_s30 = smov 120   ;;  %s2619_s9 = smov 88   ;;  %vm1766_vm4 = vcmask 392192   ;;  %vm1731_vm5 = vcmask 523264  }
  0x89   : > { %2134 = vmatprep.subr.bf16.mxu0 %v2133_v3  ;;  %v539_v17 = vld [vmem:[#allocation8 + $0x8] sm:$0xff]  ;;  %s2620_s26 = smov 80   ;;  %s2621_s10 = smov 112   ;;  %vm1769_vm6 = vcmask 654336   ;;  %vm1733_vm7 = vcmask 785408   ;;  %vm1772_vm8 = vcmask 916480  }
  0x8a   : > { %2136 = vmatpush3.bf16.msra.mxu0 %v2133_v3  ;;  %v780_v3 = vld [vmem:[#allocation8 + $0x18] sm:$0xff]  ;;  %s2622_s11 = smov 56   ;;  %s2623_s8 = smov 72  }
  0x8b   : > { %2138 = vmatprep.subr.bf16.mxu0 %v2137_v6  ;;  %s2624_s17 = smov 104   ;;  %s2625_s12 = smov 48  }
  0x8c   : > { %s2626_s20 = smov 40   ;;  %s2627_s19 = smov 16  }
  0x8d   : > { %s2628_s7 = smov 32   ;;  %s1953_s16 = sshll.u32 %s2871_s13, 3 }
  0x8e   : > { %2140 = vmatpush3.bf16.msra.mxu0 %v2137_v6  ;;  %v779_v6 = vld [vmem:[#allocation8 + $0x10] sm:$0xff] }
  0x91   : > { %2055 = vmatmul.mubr.msk.f32.vlgmr.msra.gmra.mrb[0].mxu0 %vm335_vm0, %v326_v7 }
 0x164   : > { %v2889_v8 = vpop.f32.mrb[0].mxu0 }
 0x165   : > { %v2891_v9 = vpop.f32.mrb[1].mxu0 }
 0x166   : > { %2061 = vmatprep.mubr.msk.f32.mxu1 %vm423_vm1, %v2891_v9  ;;  %v2897_v10 = vpack.i.bf16 %v2889_v8, %v2891_v9 }
 0x168   : > { %2285 = vrot.lane.b32.xlu0 %v2897_v10, %s2616_s27 }
 0x1da   : > { %v2286_v11 = vpop.permute.xlu0 %2285 }
 0x1db   : > { %v2288_v12 = vunpack.i.h.bf16 %v2286_v11  ;;  %v2287_v13 = vunpack.i.l.bf16 %v2286_v11 }
 0x1dd   : > { %v2141_v15 = vpack.c.bf16 %v2288_v12, %v2287_v13 }
 0x1df   : > { %2143 = vmatprep.subr.msk.bf16.mxu1 %vm2903_vm2, %v2141_v15 }
 0x1e0   : > { %2146 = vmatpush3.bf16.xpose.msk.msra.mxu1 %vm2903_vm2, %v2141_v15 }
 0x1e7   : > { %2062 = vmatmul.mubr.msk.f32.vlgmr.msra.gmra.mrb[0].mxu1 %vm423_vm1, %v2889_v8 }
 0x2ba   : > { %v2063_v16 = vpop.f32.mrb[0].mxu1 }
 0x2bb   : > { %v2913_v18 = vmul.f32 0.35355338, %v2063_v16  ;;  %v498_v19 = vpop.f32.mrb[1].mxu1 }
 0x2bc   : > { %v2915_v21 = vmul.f32 0.35355338, %v498_v19 }
 0x2bd   : > { %v541_v22 = vadd.f32 %v539_v17, %v2913_v18 }
 0x2be   : > { %v540_v23 = vadd.f32 %v538_v20, %v2915_v21 }
 0x2bf   : > { %v545_v24 = vsel %vm509_vm3, %v541_v22, -inf }
 0x2c0   : > { %546 = vmax.xlane.f32.xlu1 %v545_v24  ;;  %v542_v25 = vsel %vm509_vm3, %v540_v23, -inf }
 0x2c1   : > { %543 = vmax.xlane.f32.xlu0 %v542_v25 }
 0x2d1   : > { %2290 = vrot.lane.b32.xlu1 %v2897_v10, %s2617_s29 }
 0x2d7   : > { %659 = vrot.lane.b32.xlu0 %v2889_v8, %s2618_s30 }
 0x34d   : > { %v547_v26 = vpop.xlane.xlu1 %546 }
 0x34e   : > { %v549_v27 = vsub.f32 %v541_v22, %v547_v26  ;;  %v544_v28 = vpop.xlane.xlu0 %543 }
 0x34f   : > { %v548_v29 = vsub.f32 %v540_v23, %v544_v28 }
 0x350   : > { %v552_v30 = vmul.f32 1.442695, %v549_v27 }
 0x351   : > { %v550_v31 = vmul.f32 1.442695, %v548_v29  ;;  %v2291_v32 = vpop.permute.xlu1 %2290 }
 0x352   : > { %2324 = vpow2.f32 %v552_v30  ;;  %v2293_v33 = vunpack.i.h.bf16 %v2291_v32  ;;  %v2292_v34 = vunpack.i.l.bf16 %v2291_v32  ;;  %v660_v61 = vpop.permute.xlu0 %659 }
 0x353   : > { %2326 = vpow2.f32 %v550_v31  ;;  %v1182_v31 = vld [vmem:[#allocation8 + $0x20] sm:$0xff] }
 0x354   : > { %v2147_v35 = vpack.c.bf16 %v2293_v33, %v2292_v34 }
 0x356   : > { %2148 = vmatprep.subr.bf16.mxu1 %v2147_v35 }
 0x357   : > { %2150 = vmatpush3.bf16.msra.mxu1 %v2147_v35  ;;  %v1183_v35 = vld [vmem:[#allocation8 + $0x28] sm:$0xff] }
 0x35c   : > { %v2325_v36 = vpop.eup %2324 }
 0x35d   : > { %v557_v37 = vsel %vm509_vm3, %v2325_v36, 0.0  ;;  %v2327_v38 = vpop.eup %2326 }
 0x35e   : > { %558 = vadd.xlane.f32.xlu1 %v557_v37  ;;  %v554_v39 = vsel %vm509_vm3, %v2327_v38, 0.0 }
 0x362   : > { %555 = vadd.xlane.f32.xlu1 %v554_v39 }
 0x373   : > { %2295 = vrot.lane.b32.xlu1 %v2897_v10, %s2619_s9 }
 0x377   : > { %657 = vrot.lane.b32.xlu1 %v2891_v9, %s2618_s30  ;;  %s324_s30 = scalar_lea.vmem [#allocation11], %s1953_s16  ;;  %s2629_s16 = smov [#allocation11]  }
 0x37b   : > { %2300 = vrot.lane.b32.xlu1 %v2897_v10, %s2620_s26 }
 0x37f   : > { %1060 = vrot.lane.b32.xlu1 %v2891_v9, %s2621_s10 }
 0x383   : > { %1062 = vrot.lane.b32.xlu1 %v2889_v8, %s2621_s10 }
 0x3eb   : > { %v559_v40 = vpop.xlane.xlu1 %558 }
 0x3ec   : > { %2328 = vrcp.f32 %v559_v40 }
 0x3ef   : > { %v556_v41 = vpop.xlane.xlu1 %555 }
 0x3f0   : > { %2330 = vrcp.f32 %v556_v41 }
 0x3f3   : > { %v2296_v42 = vpop.permute.xlu1 %2295 }
 0x3f4   : > { %v2298_v43 = vunpack.i.h.bf16 %v2296_v42  ;;  %v2297_v44 = vunpack.i.l.bf16 %v2296_v42 }
 0x3f6   : > { %v2329_v45 = vpop.eup %2328  ;;  %v2151_v46 = vpack.c.bf16 %v2298_v43, %v2297_v44 }
 0x3f7   : > { %v563_v47 = vmul.f32 %v2329_v45, %v559_v40  ;;  %v658_v48 = vpop.permute.xlu1 %657 }
 0x3f8   : > { %2153 = vmatprep.subr.msk.bf16.mxu1 %vm2903_vm2, %v2151_v46 }
 0x3f9   : > { %v565_v50 = vsub.f32 2.0, %v563_v47 }
 0x3fa   : > { %v2331_v49 = vpop.eup %2330 }
 0x3fb   : > { %v562_v51 = vmul.f32 %v2331_v49, %v556_v41  ;;  %v2301_v53 = vpop.permute.xlu1 %2300  ;;  %v567_v54 = vmul.f32 %v2329_v45, %v565_v50 }
 0x3fc   : > { %v2303_v56 = vunpack.i.h.bf16 %v2301_v53  ;;  %v2302_v57 = vunpack.i.l.bf16 %v2301_v53 }
 0x3fd   : > { %v564_v52 = vsub.f32 2.0, %v562_v51  ;;  %v569_v59 = vmul.f32 %v2325_v36, %v567_v54 }
 0x3fe   : > { %v2161_v60 = vpack.c.bf16 %v2303_v56, %v2302_v57 }
 0x3ff   : > { %v566_v55 = vmul.f32 %v2331_v49, %v564_v52  ;;  %v1061_v62 = vpop.permute.xlu1 %1060 }
 0x401   : > { %v568_v58 = vmul.f32 %v2327_v38, %v566_v55 }
 0x403   : > { %2068 = vmatprep.mubr.msk.f32.mxu1 %vm509_vm3, %v568_v58  ;;  %v1063_v63 = vpop.permute.xlu1 %1062 }
 0x404   : > { %2069 = vmatmul.mubr.msk.f32.vlgmr.msra.gmra.mrb[2].mxu1 %vm509_vm3, %v569_v59 }
 0x405   : > { %2156 = vmatpush3.bf16.xpose.msk.msra.mxu1 %vm2903_vm2, %v2151_v46  ;;  %2075 = vmatprep.mubr.msk.f32.mxu1 %vm423_vm1, %v658_v48 }
 0x406   : > { %2163 = vmatprep.subr.msk.bf16.mxu1 %vm2903_vm2, %v2161_v60 }
 0x40c   : > { %2076 = vmatmul.mubr.msk.f32.vlgmr.msra.gmra.mrb[4].mxu1 %vm423_vm1, %v660_v61 }
 0x40d   : > { %2166 = vmatpush3.bf16.xpose.msk.msra.mxu1 %vm2903_vm2, %v2161_v60  ;;  %2099 = vmatprep.mubr.msk.f32.mxu1 %vm423_vm1, %v1061_v62 }
 0x414   : > { %2100 = vmatmul.mubr.msk.f32.vlgmr.msra.gmra.mrb[6].mxu1 %vm423_vm1, %v1063_v63 }
 0x4d7   : > { %v2948_v0 = vpop.f32.mrb[2].mxu1 }
 0x4d8   : > { %v2950_v1 = vpop.f32.mrb[3].mxu1 }
 0x4df   : > { %v2077_v2 = vpop.f32.mrb[4].mxu1 }
 0x4e0   : > { %v2952_v4 = vmul.f32 0.35355338, %v2077_v2  ;;  %v739_v5 = vpop.f32.mrb[5].mxu1 }
 0x4e1   : > { %v2954_v7 = vmul.f32 0.35355338, %v739_v5 }
 0x4e2   : > { %v782_v11 = vadd.f32 %v780_v3, %v2952_v4 }
 0x4e3   : > { %v781_v12 = vadd.f32 %v779_v6, %v2954_v7  ;;  %v332_v6 = vld [vmem:[#allocation7 + $0x8] sm:$0xff] }
 0x4e4   : > { %v786_v13 = vsel %vm509_vm3, %v782_v11, -inf }
 0x4e5   : > { %787 = vmax.xlane.f32.xlu0 %v786_v13  ;;  %v783_v15 = vsel %vm509_vm3, %v781_v12, -inf }
 0x4e6   : > { %784 = vmax.xlane.f32.xlu1 %v783_v15 }
 0x4e7   : > { %v2101_v16 = vpop.f32.mrb[6].mxu1 }
 0x4e8   : > { %v1142_v17 = vpop.f32.mrb[7].mxu1  ;;  %v2970_v34 = vmul.f32 0.35355338, %v2101_v16 }
 0x4e9   : > { %v2966_v30 = vmul.f32 0.35355338, %v1142_v17 }
 0x4ea   : > { %v1185_v36 = vadd.f32 %v1183_v35, %v2970_v34 }
 0x4eb   : > { %v1184_v32 = vadd.f32 %v1182_v31, %v2966_v30 }
 0x4ec   : > { %v1189_v37 = vsel %vm509_vm3, %v1185_v36, -inf }
 0x4ed   : > { %v1186_v33 = vsel %vm509_vm3, %v1184_v32, -inf }
 0x572   : > { %v788_v19 = vpop.xlane.xlu0 %787 }
 0x573   : > { %v790_v20 = vsub.f32 %v782_v11, %v788_v19  ;;  %v785_v22 = vpop.xlane.xlu1 %784  ;;  %v331_v11 = vld [vmem:[#allocation7] sm:$0xff] }
 0x574   : > { %v789_v23 = vsub.f32 %v781_v12, %v785_v22 }
 0x575   : > { %v793_v24 = vmul.f32 1.442695, %v790_v20  ;;  %v1506_v20 = vld [vmem:[#allocation8 + $0x30] sm:$0xff] }
 0x576   : > { %v791_v25 = vmul.f32 1.442695, %v789_v23 }
 0x577   : > { %2332 = vpow2.f32 %v793_v24 }
 0x578   : > { %2334 = vpow2.f32 %v791_v25 }
 0x581   : > { %v2333_v26 = vpop.eup %2332 }
 0x582   : > { %v2335_v27 = vpop.eup %2334  ;;  %v798_v28 = vsel %vm509_vm3, %v2333_v26, 0.0 }
 0x583   : > { %799 = vadd.xlane.f32.xlu0 %v798_v28  ;;  %v795_v29 = vsel %vm509_vm3, %v2335_v27, 0.0 }
 0x584   : > { %796 = vadd.xlane.f32.xlu1 %v795_v29 }
 0x595   : > { %2305 = vrot.lane.b32.xlu1 %v2897_v10, %s2622_s11  ;;  %s1807_s11 = sshll.u32 %s324_s30, 4  ;;  %s3088_s11 = int_to_ptr.vmem [resolvable:$true] %s1807_s11 }
 0x599   : > { %2310 = vrot.lane.b32.xlu0 %v2897_v10, %s2623_s8  ;;  %1384 = vrot.lane.b32.xlu1 %v2891_v9, %s2624_s17 }
 0x59d   : > { %1386 = vrot.lane.b32.xlu1 %v2889_v8, %s2624_s17  ;;  %v750_v8 = vsel %vm509_vm3, %v2954_v7, -inf }
 0x5b8   : > { %1187 = vmax.xlane.f32.xlu0 %v1186_v33 }
 0x5c1   : > { %1190 = vmax.xlane.f32.xlu1 %v1189_v37 }
 0x5d2   : > { %2315 = vrot.lane.b32.xlu1 %v2897_v10, %s2625_s12 }
 0x5d6   : > { %2320 = vrot.lane.b32.xlu1 %v2897_v10, %s2626_s20  ;;  %s1781_s20 = scalar_lea.sflag [#allocation12], %s2871_s13 }
 0x5fa   : > { %751 = vmax.xlane.f32.xlu1 %v750_v8 }
 0x610   : > { %v800_v9 = vpop.xlane.xlu0 %799 }
 0x611   : > { %2336 = vrcp.f32 %v800_v9  ;;  %v797_v38 = vpop.xlane.xlu1 %796 }
 0x612   : > { %2338 = vrcp.f32 %v797_v38 }
 0x614   : > { %v2311_v39 = vpop.permute.xlu0 %2310 }
 0x615   : > { %v2313_v40 = vunpack.i.h.bf16 %v2311_v39  ;;  %v2312_v41 = vunpack.i.l.bf16 %v2311_v39  ;;  %v2306_v42 = vpop.permute.xlu1 %2305 }
 0x616   : > { %v2308_v43 = vunpack.i.h.bf16 %v2306_v42  ;;  %v2307_v44 = vunpack.i.l.bf16 %v2306_v42 }
 0x617   : > { %v2171_v45 = vpack.c.bf16 %v2313_v40, %v2312_v41 }
 0x618   : > { %v2157_v46 = vpack.c.bf16 %v2308_v43, %v2307_v44  ;;  %v333_v43 = vld [vmem:[#allocation7 + $0x10] sm:$0xff] }
 0x619   : > { %2173 = vmatprep.subr.msk.bf16.mxu1 %vm2903_vm2, %v2171_v45  ;;  %v1385_v10 = vpop.permute.xlu1 %1384 }
 0x61a   : > { %2158 = vmatprep.subr.bf16.mxu0 %v2157_v46  ;;  %2176 = vmatpush3.bf16.xpose.msk.msra.mxu1 %vm2903_vm2, %v2171_v45 }
 0x61b   : > { %v2337_v47 = vpop.eup %2336  ;;  %2118 = vmatprep.mubr.msk.f32.mxu1 %vm423_vm1, %v1385_v10  ;;  %2160 = vmatpush3.bf16.msra.mxu0 %v2157_v46 }
 0x61c   : > { %v2339_v48 = vpop.eup %2338  ;;  %v804_v49 = vmul.f32 %v2337_v47, %v800_v9  ;;  %2085 = vmatprep.subr.mxu0 %v332_v6 }
 0x61d   : > { %v803_v50 = vmul.f32 %v2339_v48, %v797_v38  ;;  %v1387_v54 = vpop.permute.xlu1 %1386 }
 0x61e   : > { %v806_v51 = vsub.f32 2.0, %v804_v49 }
 0x61f   : > { %v805_v52 = vsub.f32 2.0, %v803_v50 }
 0x620   : > { %v808_v53 = vmul.f32 %v2337_v47, %v806_v51 }
 0x621   : > { %v807_v55 = vmul.f32 %v2339_v48, %v805_v52  ;;  %2119 = vmatmul.mubr.msk.f32.vlgmr.msra.gmra.mrb[8].mxu1 %vm423_vm1, %v1387_v54 }
 0x622   : > { %v810_v57 = vmul.f32 %v2333_v26, %v808_v53  ;;  %v1507_v26 = vld [vmem:[#allocation8 + $0x38] sm:$0xff] }
 0x623   : > { %v809_v56 = vmul.f32 %v2335_v27, %v807_v55  ;;  %v513_v55 = vsel %vm509_vm3, %v2913_v18, -inf }
 0x625   : > { %2082 = vmatprep.mubr.msk.f32.mxu0 %vm509_vm3, %v809_v56  ;;  %v753_v56 = vsel %vm509_vm3, %v2952_v4, -inf }
 0x626   : > { %2083 = vmatmul.mubr.msk.f32.vlgmr.msra.gmra.mrb[2].mxu0 %vm509_vm3, %v810_v57  ;;  %v1153_v57 = vsel %vm509_vm3, %v2966_v30, -inf }
 0x627   : > { %2086 = vmatpush3.msra.mxu0 %v332_v6 }
 0x628   : > { %2090 = vmatprep.subr.mxu0 %v331_v11 }
 0x645   : > { %v1188_v14 = vpop.xlane.xlu0 %1187 }
 0x646   : > { %v1192_v58 = vsub.f32 %v1184_v32, %v1188_v14  ;;  %v1156_v14 = vsel %vm509_vm3, %v2970_v34, -inf }
 0x648   : > { %v1194_v59 = vmul.f32 1.442695, %v1192_v58 }
 0x64a   : > { %2340 = vpow2.f32 %v1194_v59 }
 0x64e   : > { %v1191_v60 = vpop.xlane.xlu1 %1190 }
 0x64f   : > { %v1193_v61 = vsub.f32 %v1185_v36, %v1191_v60  ;;  %v510_v60 = vsel %vm509_vm3, %v2915_v21, -inf }
 0x651   : > { %v1196_v62 = vmul.f32 1.442695, %v1193_v61 }
 0x652   : > { %v2316_v17 = vpop.permute.xlu1 %2315 }
 0x653   : > { %2342 = vpow2.f32 %v1196_v62  ;;  %v2318_v27 = vunpack.i.h.bf16 %v2316_v17  ;;  %v2317_v28 = vunpack.i.l.bf16 %v2316_v17 }
 0x654   : > { %v2341_v63 = vpop.eup %2340 }
 0x655   : > { %v1198_v2 = vsel %vm509_vm3, %v2341_v63, 0.0  ;;  %v2167_v8 = vpack.c.bf16 %v2318_v27, %v2317_v28 }
 0x656   : > { %1199 = vadd.xlane.f32.xlu0 %v1198_v2  ;;  %v2321_v40 = vpop.permute.xlu1 %2320 }
 0x657   : > { %v2323_v44 = vunpack.i.h.bf16 %v2321_v40  ;;  %v2322_v45 = vunpack.i.l.bf16 %v2321_v40 }
 0x65d   : > { %v2343_v3 = vpop.eup %2342 }
 0x65e   : > { %v1201_v5 = vsel %vm509_vm3, %v2343_v3, 0.0 }
 0x65f   : > { %1202 = vadd.xlane.f32.xlu0 %v1201_v5 }
 0x687   : > { %v752_v2 = vpop.xlane.xlu1 %751 }
 0x688   : > { %v756_v5 = vsub.f32 %v2954_v7, %v752_v2 }
 0x6e3   : > { %v1200_v12 = vpop.xlane.xlu0 %1199 }
 0x6e4   : > { %2344 = vrcp.f32 %v1200_v12 }
 0x6ec   : > { %v1203_v13 = vpop.xlane.xlu0 %1202 }
 0x6ed   : > { %2346 = vrcp.f32 %v1203_v13 }
 0x6ee   : > { %v2345_v15 = vpop.eup %2344 }
 0x6ef   : > { %v1206_v25 = vmul.f32 %v2345_v15, %v1200_v12 }
 0x6f1   : > { %v1208_v37 = vsub.f32 2.0, %v1206_v25 }
 0x6f3   : > { %v1210_v39 = vmul.f32 %v2345_v15, %v1208_v37 }
 0x6f4   : > { %v2120_v16 = vpop.f32.mrb[8].mxu1 }
 0x6f5   : > { %v1466_v19 = vpop.f32.mrb[9].mxu1  ;;  %v2989_v22 = vmul.f32 0.35355338, %v2120_v16  ;;  %v1212_v42 = vmul.f32 %v2341_v63, %v1210_v39 }
 0x6f6   : > { %v2991_v23 = vmul.f32 0.35355338, %v1466_v19 }
 0x6f7   : > { %v2347_v24 = vpop.eup %2346  ;;  %v1509_v36 = vadd.f32 %v1507_v26, %v2989_v22  ;;  %v1480_v59 = vsel %vm509_vm3, %v2989_v22, -inf }
 0x6f8   : > { %v1508_v29 = vadd.f32 %v1506_v20, %v2991_v23  ;;  %v1207_v32 = vmul.f32 %v2347_v24, %v1203_v13  ;;  %v1477_v58 = vsel %vm509_vm3, %v2991_v23, -inf  ;;  %v758_v13 = vmul.f32 1.442695, %v756_v5 }
 0x6f9   : > { %v2084_v31 = vpop.f32.mrb[2].mxu0  ;;  %v1513_v38 = vsel %vm509_vm3, %v1509_v36, -inf }
 0x6fa   : > { %v889_v33 = vpop.f32.mrb[3].mxu0  ;;  %v1510_v35 = vsel %vm509_vm3, %v1508_v29, -inf  ;;  %v1209_v9 = vsub.f32 2.0, %v1207_v32 }
 0x6fb   : > { %1511 = vmax.xlane.f32.xlu0 %v1510_v35  ;;  %2087 = vmatprep.mubr.msk.f32.mxu0 %vm423_vm1, %v889_v33 }
 0x6fc   : > { %2088 = vmatmul.mubr.msk.f32.vlgmr.msra.gmra.mrb[4].mxu0 %vm423_vm1, %v2084_v31  ;;  %v1211_v41 = vmul.f32 %v2347_v24, %v1209_v9 }
 0x6fd   : > { %2091 = vmatpush3.msra.mxu0 %v331_v11  ;;  %2092 = vmatprep.mubr.msk.f32.mxu0 %vm423_vm1, %v2950_v1  ;;  %v2177_v1 = vpack.c.bf16 %v2323_v44, %v2322_v45 }
 0x6fe   : > { %2168 = vmatprep.subr.bf16.mxu0 %v2167_v8  ;;  %v1213_v46 = vmul.f32 %v2343_v3, %v1211_v41 }
 0x6ff   : > { %1514 = vmax.xlane.f32.xlu0 %v1513_v38 }
 0x704   : > { %2093 = vmatmul.mubr.msk.f32.vlgmr.msra.gmra.mrb[4].mxu0 %vm423_vm1, %v2948_v0 }
 0x705   : > { %2170 = vmatpush3.bf16.msra.mxu0 %v2167_v8  ;;  %2106 = vmatprep.mubr.msk.f32.mxu0 %vm509_vm3, %v1212_v42 }
 0x706   : > { %2109 = vmatprep.subr.mxu0 %v333_v43 }
 0x708   : > { %2107 = vmatmul.mubr.msk.f32.vlgmr.msra.gmra.mrb[6].mxu0 %vm509_vm3, %v1213_v46 }
 0x709   : > { %2110 = vmatpush3.msra.mxu0 %v333_v43 }
 0x70a   : > { %2178 = vmatprep.subr.bf16.mxu0 %v2177_v1 }
 0x788   : > { %v1512_v10 = vpop.xlane.xlu0 %1511 }
 0x789   : > { %v1516_v47 = vsub.f32 %v1508_v29, %v1512_v10 }
 0x78b   : > { %v1518_v48 = vmul.f32 1.442695, %v1516_v47 }
 0x78c   : > { %v1515_v49 = vpop.xlane.xlu0 %1514 }
 0x78d   : > { %2348 = vpow2.f32 %v1518_v48  ;;  %v1517_v50 = vsub.f32 %v1509_v36, %v1515_v49 }
 0x78f   : > { %v1520_v51 = vmul.f32 1.442695, %v1517_v50 }
 0x791   : > { %2350 = vpow2.f32 %v1520_v51 }
 0x797   : > { %v2349_v52 = vpop.eup %2348 }
 0x798   : > { %v1522_v0 = vsel %vm509_vm3, %v2349_v52, 0.0 }
 0x799   : > { %1523 = vadd.xlane.f32.xlu0 %v1522_v0  ;;  %v334_v0 = vld [vmem:[#allocation7 + $0x18] sm:$0xff] }
 0x79b   : > { %v2351_v53 = vpop.eup %2350 }
 0x79c   : > { %v1525_v54 = vsel %vm509_vm3, %v2351_v53, 0.0 }
 0x79d   : > { %1526 = vadd.xlane.f32.xlu0 %v1525_v54 }
 0x7a1   : > { %514 = vmax.xlane.f32.xlu0 %v513_v55 }
 0x7a5   : > { %754 = vmax.xlane.f32.xlu0 %v753_v56 }
 0x7a9   : > { %1154 = vmax.xlane.f32.xlu0 %v1153_v57 }
 0x7ad   : > { %1157 = vmax.xlane.f32.xlu0 %v1156_v14 }
 0x7b1   : > { %1478 = vmax.xlane.f32.xlu0 %v1477_v58 }
 0x7b5   : > { %1481 = vmax.xlane.f32.xlu0 %v1480_v59 }
 0x7b9   : > { %511 = vmax.xlane.f32.xlu0 %v510_v60 }
 0x7db   : > { %v2108_v61 = vpop.f32.mrb[6].mxu0 }
 0x7dc   : > { %v1292_v62 = vpop.f32.mrb[7].mxu0 }
 0x7dd   : > { %2111 = vmatprep.mubr.msk.f32.mxu0 %vm423_vm1, %v1292_v62 }
 0x7de   : > { %2112 = vmatmul.mubr.msk.f32.vlgmr.msra.gmra.mrb[4].mxu0 %vm423_vm1, %v2108_v61 }
 0x7df   : > { %2180 = vmatpush3.bf16.msra.mxu0 %v2177_v1 }
 0x7e0   : > { %2128 = vmatprep.subr.mxu0 %v334_v0 }
 0x826   : > { %v1524_v63 = vpop.xlane.xlu0 %1523 }
 0x827   : > { %2352 = vrcp.f32 %v1524_v63 }
 0x82a   : > { %v1527_v3 = vpop.xlane.xlu0 %1526 }
 0x82b   : > { %2354 = vrcp.f32 %v1527_v3 }
 0x82e   : > { %v515_v6 = vpop.xlane.xlu0 %514 }
 0x82f   : > { %v517_v11 = vsub.f32 %v2913_v18, %v515_v6 }
 0x831   : > { %v2353_v12 = vpop.eup %2352  ;;  %v520_v15 = vmul.f32 1.442695, %v517_v11 }
 0x832   : > { %v1530_v16 = vmul.f32 %v2353_v12, %v1524_v63  ;;  %v755_v17 = vpop.xlane.xlu0 %754 }
 0x833   : > { %2356 = vpow2.f32 %v520_v15  ;;  %v757_v19 = vsub.f32 %v2952_v4, %v755_v17 }
 0x834   : > { %v1532_v20 = vsub.f32 2.0, %v1530_v16  ;;  %2358 = vpow2.f32 %v758_v13 }
 0x835   : > { %v2355_v24 = vpop.eup %2354  ;;  %v760_v25 = vmul.f32 1.442695, %v757_v19 }
 0x836   : > { %v1534_v26 = vmul.f32 %v2353_v12, %v1532_v20  ;;  %v1531_v27 = vmul.f32 %v2355_v24, %v1527_v3  ;;  %v1155_v28 = vpop.xlane.xlu0 %1154 }
 0x837   : > { %v1159_v7 = vsub.f32 %v2966_v30, %v1155_v28  ;;  %2360 = vpow2.f32 %v760_v25 }
 0x838   : > { %v1536_v29 = vmul.f32 %v2349_v52, %v1534_v26  ;;  %v1533_v31 = vsub.f32 2.0, %v1531_v27 }
 0x839   : > { %v1161_v18 = vmul.f32 1.442695, %v1159_v7 }
 0x83a   : > { %v1535_v32 = vmul.f32 %v2355_v24, %v1533_v31  ;;  %v1158_v33 = vpop.xlane.xlu0 %1157  ;;  %2125 = vmatprep.mubr.msk.f32.mxu0 %vm509_vm3, %v1536_v29 }
 0x83b   : > { %2362 = vpow2.f32 %v1161_v18  ;;  %v1160_v4 = vsub.f32 %v2970_v34, %v1158_v33 }
 0x83c   : > { %v1537_v35 = vmul.f32 %v2351_v53, %v1535_v32 }
 0x83d   : > { %v2357_v36 = vpop.eup %2356  ;;  %v1163_v37 = vmul.f32 1.442695, %v1160_v4 }
 0x83e   : > { %v1479_v8 = vpop.xlane.xlu0 %1478  ;;  %2126 = vmatmul.mubr.msk.f32.vlgmr.msra.gmra.mrb[8].mxu0 %vm509_vm3, %v1537_v35  ;;  %v525_v9 = vsel %vm509_vm3, %v2357_v36, 0.0  ;;  %v3031_v30 = vpop.eup %2358 }
 0x83f   : > { %2364 = vpow2.f32 %v1163_v37  ;;  %v1483_v38 = vsub.f32 %v2991_v23, %v1479_v8  ;;  %526 = vadd.xlane.f32.xlu0 %v525_v9  ;;  %v762_v41 = vsel %vm509_vm3, %v3031_v30, 0.0  ;;  %2129 = vmatpush3.msra.mxu0 %v334_v0 }
 0x841   : > { %v1485_v39 = vmul.f32 1.442695, %v1483_v38  ;;  %v3036_v34 = vpop.eup %2360 }
 0x842   : > { %v1482_v40 = vpop.xlane.xlu0 %1481  ;;  %v765_v23 = vsel %vm509_vm3, %v3036_v34, 0.0 }
 0x843   : > { %2366 = vpow2.f32 %v1485_v39  ;;  %v1484_v42 = vsub.f32 %v2989_v22, %v1482_v40  ;;  %763 = vadd.xlane.f32.xlu0 %v762_v41 }
 0x845   : > { %v3039_v43 = vpop.eup %2362  ;;  %v1487_v44 = vmul.f32 1.442695, %v1484_v42 }
 0x846   : > { %v512_v45 = vpop.xlane.xlu0 %511  ;;  %v1165_v46 = vsel %vm509_vm3, %v3039_v43, 0.0 }
 0x847   : > { %2368 = vpow2.f32 %v1487_v44  ;;  %v516_v1 = vsub.f32 %v2915_v21, %v512_v45  ;;  %1166 = vadd.xlane.f32.xlu1 %v1165_v46  ;;  %766 = vadd.xlane.f32.xlu0 %v765_v23 }
 0x849   : > { %v2365_v10 = vpop.eup %2364  ;;  %v518_v47 = vmul.f32 1.442695, %v516_v1 }
 0x84a   : > { %v1168_v22 = vsel %vm509_vm3, %v2365_v10, 0.0 }
 0x84b   : > { %2370 = vpow2.f32 %v518_v47  ;;  %1169 = vadd.xlane.f32.xlu0 %v1168_v22 }
 0x84d   : > { %v3047_v48 = vpop.eup %2366 }
 0x84e   : > { %v1489_v49 = vsel %vm509_vm3, %v3047_v48, 0.0 }
 0x84f   : > { %1490 = vadd.xlane.f32.xlu1 %v1489_v49 }
 0x851   : > { %v3051_v50 = vpop.eup %2368 }
 0x852   : > { %v1492_v51 = vsel %vm509_vm3, %v3051_v50, 0.0 }
 0x853   : > { %1493 = vadd.xlane.f32.xlu0 %v1492_v51 }
 0x855   : > { %v3055_v21 = vpop.eup %2370 }
 0x856   : > { %v522_v52 = vsel %vm509_vm3, %v3055_v21, 0.0 }
 0x857   : > { %523 = vadd.xlane.f32.xlu1 %v522_v52 }
 0x8cc   : > { %v527_v53 = vpop.xlane.xlu0 %526 }
 0x8cd   : > { %2372 = vrcp.f32 %v527_v53 }
 0x8d0   : > { %v764_v54 = vpop.xlane.xlu0 %763 }
 0x8d1   : > { %2374 = vrcp.f32 %v764_v54 }
 0x8d4   : > { %v1167_v55 = vpop.xlane.xlu1 %1166  ;;  %v767_v56 = vpop.xlane.xlu0 %766 }
 0x8d5   : > { %2376 = vrcp.f32 %v1167_v55 }
 0x8d6   : > { %2378 = vrcp.f32 %v767_v56 }
 0x8d7   : > { %v2373_v57 = vpop.eup %2372 }
 0x8d8   : > { %v531_v14 = vmul.f32 %v2373_v57, %v527_v53  ;;  %v1170_v58 = vpop.xlane.xlu0 %1169  ;;  %v1988_v53 = vld [vmem:[%s3169_s3] ss:$0 sm:$0xff] }
 0x8d9   : > { %2380 = vrcp.f32 %v1170_v58 }
 0x8da   : > { %v533_v59 = vsub.f32 2.0, %v531_v14 }
 0x8db   : > { %v2375_v60 = vpop.eup %2374 }
 0x8dc   : > { %v535_v61 = vmul.f32 %v2373_v57, %v533_v59  ;;  %v1491_v62 = vpop.xlane.xlu1 %1490  ;;  %v770_v3 = vmul.f32 %v2375_v60, %v764_v54 }
 0x8dd   : > { %2382 = vrcp.f32 %v1491_v62 }
 0x8de   : > { %v537_v63 = vmul.f32 %v2357_v36, %v535_v61  ;;  %v772_v15 = vsub.f32 2.0, %v770_v3 }
 0x8df   : > { %v2377_v2 = vpop.eup %2376 }
 0x8e0   : > { %v2379_v5 = vpop.eup %2378  ;;  %1737 = vrot.lane.b32.xlu0 %v537_v63, %s2627_s19  ;;  %v1494_v6 = vpop.xlane.xlu0 %1493  ;;  %v1173_v12 = vmul.f32 %v2377_v2, %v1167_v55  ;;  %v774_v26 = vmul.f32 %v2375_v60, %v772_v15  ;;  %s2502_s19 = scalar_lea.vmem %s3088_s11, 128 }
 0x8e1   : > { %v771_v11 = vmul.f32 %v2379_v5, %v767_v56  ;;  %2384 = vrcp.f32 %v1494_v6  ;;  %p2503_p10 = scmp.ne.s32.totalorder %s3088_s11, %s2502_s19 }
 0x8e2   : > { %v1175_v20 = vsub.f32 2.0, %v1173_v12  ;;  %v776_v33 = vmul.f32 %v3031_v30, %v774_v26 }
 0x8e3   : > { %v2381_v13 = vpop.eup %2380  ;;  %v773_v16 = vsub.f32 2.0, %v771_v11  ;;  %p2504_p3 = pnand %p2503_p10, %p2820_p5 }
 0x8e4   : > { %v1174_v17 = vmul.f32 %v2381_v13, %v1170_v58  ;;  %v1177_v29 = vmul.f32 %v2377_v2, %v1175_v20  ;;  %v524_v40 = vpop.xlane.xlu1 %523 }
 0x8e5   : > { %v775_v19 = vmul.f32 %v2379_v5, %v773_v16  ;;  %2386 = vrcp.f32 %v524_v40  ;;  %p2505_p7 = pneg %p2504_p3 }
 0x8e6   : > { %v1176_v24 = vsub.f32 2.0, %v1174_v17  ;;  %v1179_v37 = vmul.f32 %v3039_v43, %v1177_v29 }
 0x8e7   : > { %v2383_v25 = vpop.eup %2382  ;;  %v777_v27 = vmul.f32 %v3036_v34, %v775_v19 }
 0x8e8   : > { %v1178_v28 = vmul.f32 %v2381_v13, %v1176_v24  ;;  %v1497_v7 = vmul.f32 %v2383_v25, %v1491_v62 }
 0x8e9   : > { %1745 = vrot.lane.b32.xlu1 %v777_v27, %s2625_s12 }
 0x8ea   : > { %v1499_v31 = vsub.f32 2.0, %v1497_v7  ;;  %v1180_v18 = vmul.f32 %v2365_v10, %v1178_v28 }
 0x8eb   : > { %v2385_v32 = vpop.eup %2384 }
 0x8ec   : > { %v1498_v4 = vmul.f32 %v2385_v32, %v1494_v6  ;;  %1753 = vrot.lane.b32.xlu0 %v1180_v18, %s2620_s26  ;;  %v1501_v35 = vmul.f32 %v2383_v25, %v1499_v31 }
 0x8ed   : > { %1741 = vrot.lane.b32.xlu1 %v776_v33, %s2628_s7 }
 0x8ee   : > { %v1500_v36 = vsub.f32 2.0, %v1498_v4  ;;  %v1503_v9 = vmul.f32 %v3047_v48, %v1501_v35 }
 0x8ef   : > { %v2387_v41 = vpop.eup %2386 }
 0x8f0   : > { %1749 = vrot.lane.b32.xlu0 %v1179_v37, %s2617_s29  ;;  %v1502_v8 = vmul.f32 %v2385_v32, %v1500_v36  ;;  %v530_v34 = vmul.f32 %v2387_v41, %v524_v40 }
 0x8f2   : > { %v1504_v38 = vmul.f32 %v3051_v50, %v1502_v8  ;;  %v532_v42 = vsub.f32 2.0, %v530_v34 }
 0x8f4   : > { %1757 = vrot.lane.b32.xlu0 %v1503_v9, %s2616_s27  ;;  %v534_v44 = vmul.f32 %v2387_v41, %v532_v42 }
 0x8f6   : > { %v536_v23 = vmul.f32 %v3055_v21, %v534_v44 }
 0x8f8   : > { %1761 = vrot.lane.b32.xlu0 %v1504_v38, %s2621_s10  ;;  %s1992_s10 = sshll.u32 %s2687_s25, 7 }
 0x8f9   : > { %s3086_s12 = scalar_lea.hbm %s3172_s6, %s1992_s10 }
 0x911   : > { %v2127_v30 = vpop.f32.mrb[8].mxu0 }
 0x912   : > { %v1616_v39 = vpop.f32.mrb[9].mxu0 }
 0x913   : > { %2130 = vmatprep.mubr.msk.f32.mxu0 %vm423_vm1, %v1616_v39 }
 0x914   : > { %2131 = vmatmul.mubr.msk.f32.vlgmr.msra.gmra.mrb[4].mxu0 %vm423_vm1, %v2127_v30 }
 0x952   : > { %v1738_v43 = vpop.permute.xlu0 %1737 }
 0x953   : > { %v1764_v10 = vsel %vm509_vm3, %v536_v23, %v1738_v43 }
 0x95b   : > { %v1746_v45 = vpop.permute.xlu1 %1745 }
 0x95e   : > { %v1754_v46 = vpop.permute.xlu0 %1753 }
 0x95f   : > { %v1742_v1 = vpop.permute.xlu1 %1741 }
 0x960   : > { %v1765_v47 = vsel %vm335_vm0, %v1764_v10, %v1742_v1 }
 0x961   : > { %v1767_v48 = vsel %vm1766_vm4, %v1765_v47, %v1746_v45 }
 0x962   : > { %v1750_v22 = vpop.permute.xlu0 %1749 }
 0x963   : > { %v1768_v49 = vsel %vm1731_vm5, %v1767_v48, %v1750_v22 }
 0x964   : > { %v1770_v51 = vsel %vm1769_vm6, %v1768_v49, %v1754_v46 }
 0x966   : > { %v1758_v50 = vpop.permute.xlu0 %1757 }
 0x967   : > { %v1771_v21 = vsel %vm1733_vm7, %v1770_v51, %v1758_v50 }
 0x96a   : > { %v1762_v52 = vpop.permute.xlu0 %1761 }
 0x96b   : > { %v1773_v0 = vsel %vm1772_vm8, %v1771_v21, %v1762_v52 }
 0x96c   : > { %1774 = vst [vmem:[%s324_s30] sm:$0xff] %v1773_v0  ;;  %s2506_s30 = sshll.u32 %s2629_s16, 4  ;;  %s2507_s30 = int_to_ptr.vmem [resolvable:$false] %s2506_s30 }
 0x96d   : > { %p2509_p12 = scmp.lt.s32.totalorder %s3088_s11, %s2507_s30 }
 0x9e7   : > { %v2132_v54 = vpop.f32.mrb[4].mxu0 }
 0x9e8   : > { %v1716_v55 = vadd.f32 %v2132_v54, %v1988_v53  ;;  %v1697_v56 = vpop.f32.mrb[5].mxu0 }
 0x9e9   : > { %v1715_v57 = vadd.f32 %v1988_v53, %v1697_v56 }
 0x9ea   : > { %1723 = vrot.lane.b32.xlu1 %v1716_v55, %s2617_s29  ;;  %s2508_s29 = scalar_lea.vmem %s2507_s30, 256 }
 0x9eb   : > { %v1718_v14 = vrot.slane %v1715_v57, 4  ;;  %p2510_p1 = scmp.lt.s32.totalorder %s2508_s29, %s2502_s19 }
 0x9ed   : > { %p2511_p2 = por %p2510_p1, %p2509_p12 }
 0x9ef   : > { %p2512_p4 = pnand %p2511_p2, %p2505_p7 }
 0x9f1   : > { %2515 = shalt.err (!%p2512_p4)
}
 0x9f2   : > { %s2516_s9 = scalar_lea.hbm %s3086_s12, 128  ;;  %s2520_s8 = scalar_lea.hbm %s3172_s6, 256 }
 0x9f3   : > { %p2517_p9 = scmp.ne.s32.totalorder %s3086_s12, %s2516_s9  ;;  %p2521_p11 = scmp.lt.u32.totalorder %s3086_s12, %s3172_s6 }
 0x9f4   : > { %p2522_p13 = scmp.lt.u32.totalorder %s2520_s8, %s2516_s9  ;;  %p2524_p10 = scmp.lt.u32.totalorder %s2516_s9, %s3086_s12 }
 0x9f5   : > { %p2518_p0 = pnand %p2517_p9, %p2820_p5 }
 0x9f6   : > { %p2523_p6 = por %p2522_p13, %p2521_p11 }
 0x9f7   : > { %p2519_p8 = pneg %p2518_p0 }
 0x9f8   : > { %p2525_p3 = por %p2524_p10, %p2523_p6 }
 0x9fa   : > { %p2526_p7 = pnand %p2525_p3, %p2519_p8 }
 0x9fc   : > { %2529 = shalt.err (!%p2526_p7)
}
 0x9fd   : > { %2202 = dma.vmem_to_hbm [thread:$0]  (%p2820_p5), %s3088_s11, 128, %s3086_s12, %s1781_s20   ;;  %1719 = vrot.lane.b32.xlu1 %v1718_v14, %s2628_s7  ;;  %v1726_v58 = vrot.slane %v1716_v55, 4 }
 0x9fe   : > { %s1952_s19 = sshll.u32 %s2871_s13, 2  ;;  %s1991_s30 = sshll.u32 %s2687_s25, 6 }
 0x9ff   : > { %s317_s29 = scalar_lea.vmem [#allocation10], %s1952_s19  ;;  %s3121_s7 = scalar_lea.hbm %s3171_s5, %s1991_s30 }
 0xa00   : > { %s1794_s9 = sshll.u32 %s317_s29, 4  ;;  %s2630_s12 = smov [#allocation10]   ;;  %s3123_s9 = int_to_ptr.vmem [resolvable:$true] %s1794_s9 }
 0xa01   : > { %1727 = vrot.lane.b32.xlu1 %v1726_v58, %s2616_s27  ;;  %s1776_s27 = scalar_lea.sflag [#allocation4], %s2871_s13  ;;  %s2530_s25 = scalar_lea.vmem %s3123_s9, 64 }
 0xa02   : > { %p2531_p12 = scmp.ne.s32.totalorder %s3123_s9, %s2530_s25  ;;  %s2534_s20 = sshll.u32 %s2630_s12, 4  ;;  %s2535_s20 = int_to_ptr.vmem [resolvable:$false] %s2534_s20 }
 0xa03   : > { %s2536_s10 = scalar_lea.vmem %s2535_s20, 128  ;;  %p2537_p4 = scmp.lt.s32.totalorder %s3123_s9, %s2535_s20 }
 0xa04   : > { %p2532_p1 = pnand %p2531_p12, %p2820_p5  ;;  %p2538_p9 = scmp.lt.s32.totalorder %s2536_s10, %s2530_s25 }
 0xa06   : > { %p2533_p2 = pneg %p2532_p1  ;;  %p2539_p0 = por %p2538_p9, %p2537_p4 }
 0xa08   : > { %p2540_p8 = pnand %p2539_p0, %p2533_p2 }
 0xa5c   : > { %v1724_v59 = vpop.permute.xlu1 %1723 }
 0xa6f   : > { %v1720_v60 = vpop.permute.xlu1 %1719 }
 0xa70   : > { %v1730_v61 = vsel %vm335_vm0, %v1715_v57, %v1720_v60 }
 0xa71   : > { %v1732_v62 = vsel %vm1731_vm5, %v1730_v61, %v1724_v59 }
 0xa73   : > { %v1728_v63 = vpop.permute.xlu1 %1727 }
 0xa74   : > { %v1734_v2 = vsel %vm1733_vm7, %v1732_v62, %v1728_v63 }
 0xa75   : > { %1735 = vst [vmem:[%s317_s29] sm:$0xf] %v1734_v2 }
 0xa76   : > { %2543 = shalt.err (!%p2540_p8)
}
 0xa77   : > { %s2544_s13 = scalar_lea.hbm %s3121_s7, 64  ;;  %s2548_s16 = scalar_lea.hbm %s3171_s5, 128 }
 0xa78   : > { %p2545_p11 = scmp.ne.s32.totalorder %s3121_s7, %s2544_s13  ;;  %p2549_p10 = scmp.lt.u32.totalorder %s3121_s7, %s3171_s5 }
 0xa79   : > { %p2550_p3 = scmp.lt.u32.totalorder %s2548_s16, %s2544_s13  ;;  %p2552_p12 = scmp.lt.u32.totalorder %s2544_s13, %s3121_s7 }
 0xa7a   : > { %p2546_p13 = pnand %p2545_p11, %p2820_p5 }
 0xa7b   : > { %p2551_p7 = por %p2550_p3, %p2549_p10 }
 0xa7c   : > { %p2547_p6 = pneg %p2546_p13 }
 0xa7d   : > { %p2553_p1 = por %p2552_p12, %p2551_p7 }
 0xa7f   : > { %p2554_p2 = pnand %p2553_p1, %p2547_p6 }
 0xa81   : > { %2557 = shalt.err (!%p2554_p2)
}
 0xa82   : > { %2201 = dma.vmem_to_hbm [thread:$0]  (%p2820_p5), %s3123_s9, 64, %s3121_s7, %s1776_s27  }
 0xa83 PF: > { %s1819_s29 = sand.u32 1, %s2596_s21   ;;  %p3192_p4 = scmp.ne.s32.totalorder %s3177_s28, 0 }
 0xa84   : > { %p3193_p9 = scmp.ge.s32.totalorder %s2608_s24, 2  ;;  %s1820_s26 = scalar_lea.sflag [#allocation4], %s1819_s29 }
 0xa86   : > { %p2220_p0 = pnand %p3193_p9, %p3192_p4 }
 0xa88   : > { %2587 = dma.done.wait (!%p2220_p0), %s1820_s26, 64  }
 0xa89   : > { %2589 = vsyncadd (!%p2220_p0), %s1820_s26, 4294967232  ;;  %s1829_s11 = scalar_lea.sflag [#allocation12], %s1819_s29 }
 0xa8a   : > { %2591 = dma.done.wait (!%p2220_p0), %s1829_s11, 128  }
 0xa8b   : > { %2593 = vsyncadd (!%p2220_p0), %s1829_s11, 4294967168  ;;  %p25_p5 = scmp.ge.s32.totalorder %s2806_s18, 4   ;;  %s3194_s21 = smov %s2600_s22 }
 0xa8c   : > { %s3195_s22 = smov %s2604_s23  ;;  %s3196_s23 = smov %s2816_s14 }
 0xa8d   : > { %s3197_s24 = smov %s2806_s18  ;;  %27 = sbr.rel (!%p25_p5) target bundleno = 9 (0x9), region = 117 }
 0xa94   :  { %1834 = vsyncpa [#allocation3], 1 }
 0xa95   :  { %1836 = vsyncpa [#allocation3 + $0x1], 1 }
 0xa96   :  { %1837 = vsyncpa [#allocation6], 1 }
 0xa97   :  { %1838 = vsyncpa [#allocation9], 1 }
 0xa98   :  { %1839 = vsyncpa [#allocation4], 1 }
 0xa99   :  { %1841 = vsyncpa [#allocation4 + $0x1], 1 }
 0xa9a   :  { %1842 = vsyncpa [#allocation12], 1 }
 0xa9b   :  { %1844 = vsyncpa [#allocation12 + $0x1], 1 }

</bundles_post_ra>
